<compile_context>
chip_gen: v7x
topology: tpu7x:2x2x1
jax: 0.10.0
libtpu: 0.0.40
codegen_flags: <defaults>
</compile_context>

<pallas_src>
import functools

import jax
import jax.numpy as jnp
from jax import lax
from jax.experimental import pallas as pl
from jax.experimental.pallas import tpu as pltpu


# ------------------------------ Pallas kernel ------------------------------ #

def _lstm_ff_fused_kernel(x_ref, wih0_ref, whh0_ref, b0_ref,
                          wih1_ref, whh1_ref, b1_ref,
                          wfc_ref, bfc_ref, out_ref, *, seq_len, batch):
    """Fused 2-layer bidirectional LSTM + Linear(2H -> 1).

    x_ref:    (T*B, D)   time-major-flattened input (row n = t*B + b)
    wihL_ref: (D_l, 8H)  [fwd i,f,g,o | bwd i,f,g,o] input->gate weights (transposed)
    whhL_ref: (2H, 8H)   block-diagonal hidden->gate weights (fwd top-left, bwd bottom-right)
    bL_ref:   (1, 8H)    combined bias (b_ih + b_hh) for both directions
    wfc_ref:  (1, 2H)    FC weight row
    bfc_ref:  (1, 1)     FC bias
    out_ref:  (T*B, 1)   FC output (time-major-flattened)
    """
    T, B = seq_len, batch
    H8 = whh0_ref.shape[1]
    H = H8 // 8
    H2, H4 = 2 * H, 4 * H

    # tanh for the cell-candidate gate g, sigmoid for i/f/o — one static lane
    # mask, hoisted out of the loop (JAX does not CSE broadcast_in_dim).
    lane = lax.broadcasted_iota(jnp.int32, (B, H8), 1)
    g_mask = ((lane % H4) >= 2 * H) & ((lane % H4) < 3 * H)

    def bidir_layer(x2d, wih, whh, bias):
        # Hoisted input projection for BOTH directions and all timesteps.
        xw = jnp.dot(x2d, wih, preferred_element_type=jnp.float32) + bias
        h = jnp.zeros((B, H2), jnp.float32)      # [h_fwd | h_bwd] on lanes
        c = jnp.zeros((B, H2), jnp.float32)
        h_f = [None] * T
        h_b = [None] * T
        for t in range(T):                       # static unroll (T is small)
            tb = T - 1 - t                       # reverse direction timestep
            gx = jnp.concatenate(
                [xw[t * B:(t + 1) * B, :H4],     # fwd gates @ time t
                 xw[tb * B:(tb + 1) * B, H4:]],  # bwd gates @ time T-1-t
                axis=-1)                         # (B, 8H)
            # single 256-lane-wide recurrent matmul covering both directions
            gates = gx + jnp.dot(h, whh, preferred_element_type=jnp.float32)
            act = jnp.where(g_mask, jnp.tanh(gates), jax.nn.sigmoid(gates))
            i_ = jnp.concatenate([act[:, 0 * H:1 * H], act[:, H4 + 0 * H:H4 + 1 * H]], -1)
            f_ = jnp.concatenate([act[:, 1 * H:2 * H], act[:, H4 + 1 * H:H4 + 2 * H]], -1)
            g_ = jnp.concatenate([act[:, 2 * H:3 * H], act[:, H4 + 2 * H:H4 + 3 * H]], -1)
            o_ = jnp.concatenate([act[:, 3 * H:4 * H], act[:, H4 + 3 * H:H4 + 4 * H]], -1)
            c = f_ * c + i_ * g_
            h = o_ * jnp.tanh(c)
            h_f[t] = h[:, :H]                    # forward output for time t
            h_b[tb] = h[:, H:]                   # backward output for time T-1-t
        rows = [jnp.concatenate([h_f[s], h_b[s]], axis=-1) for s in range(T)]
        return jnp.concatenate(rows, axis=0)     # (T*B, 2H), [fwd | bwd] features

    y0 = bidir_layer(x_ref[...], wih0_ref[...], whh0_ref[...], b0_ref[...])
    y1 = bidir_layer(y0, wih1_ref[...], whh1_ref[...], b1_ref[...])

    # FC head (2H -> 1): VPU multiply + lane reduction, no 1-column MXU matmul.
    out_ref[...] = (jnp.sum(y1 * wfc_ref[...], axis=-1, keepdims=True)
                    + bfc_ref[...])


# --------------------------- Parameter preparation -------------------------- #

def init_params(key, in_features, hidden):
    """PyTorch-layout params, uniform(-1/sqrt(H), 1/sqrt(H)) like nn.LSTM/Linear."""
    bound = 1.0 / float(hidden) ** 0.5
    keys = jax.random.split(key, 20)
    idx = 0

    def u(k, shape):
        return jax.random.uniform(k, shape, jnp.float32, -bound, bound)

    params = {}
    layer_in = in_features
    for layer in range(2):
        d = layer_in
        p = {}
        for suf in ["", "_rev"]:
            p[f"w_ih{suf}"] = u(keys[idx], (4 * hidden, d)); idx += 1
            p[f"w_hh{suf}"] = u(keys[idx], (4 * hidden, hidden)); idx += 1
            p[f"b_ih{suf}"] = u(keys[idx], (4 * hidden,)); idx += 1
            p[f"b_hh{suf}"] = u(keys[idx], (4 * hidden,)); idx += 1
        params[f"l{layer}"] = p
        layer_in = 2 * hidden           # bidirectional concat feeds layer 1
    params["fc1_w"] = u(keys[idx], (1, 2 * hidden)); idx += 1
    params["fc1_b"] = u(keys[idx], (1,)); idx += 1
    return params


def prepare_fused_params(params):
    """One-time conversion from PyTorch layout to the fused kernel layout."""
    fused = {}
    for layer in range(2):
        p = params[f"l{layer}"]
        H = p["w_hh"].shape[1]
        wih = jnp.concatenate([p["w_ih"].T, p["w_ih_rev"].T], axis=1)       # (D_l, 8H)
        z = jnp.zeros((H, 4 * H), jnp.float32)
        whh = jnp.concatenate(
            [jnp.concatenate([p["w_hh"].T, z], axis=1),
             jnp.concatenate([z, p["w_hh_rev"].T], axis=1)], axis=0)        # (2H, 8H)
        b = jnp.concatenate([p["b_ih"] + p["b_hh"],
                             p["b_ih_rev"] + p["b_hh_rev"]]).reshape(1, 8 * H)
        fused[f"wih{layer}"] = wih
        fused[f"whh{layer}"] = whh
        fused[f"b{layer}"] = b
    fused["wfc"] = params["fc1_w"].reshape(1, -1)    # (1, 2H)
    fused["bfc"] = params["fc1_b"].reshape(1, 1)     # (1, 1)
    return fused


# ------------------------------ JAX wrapper --------------------------------- #

def lstm_ff_forward(fused_params, x_btd):
    """Forward pass of LSTM_FF. x_btd: (B, T, in_features) -> (B, T, 1)."""
    B, T, _ = x_btd.shape
    # Time-major flatten (row n = t*B + b) so every per-step access in the
    # kernel is a contiguous static 2D row slice.
    x_tm = jnp.transpose(x_btd.astype(jnp.float32), (1, 0, 2)).reshape(T * B, -1)
    vmem = pl.BlockSpec(memory_space=pltpu.MemorySpace.VMEM)
    out = pl.pallas_call(
        functools.partial(_lstm_ff_fused_kernel, seq_len=T, batch=B),
        out_shape=jax.ShapeDtypeStruct((T * B, 1), jnp.float32),
        in_specs=[vmem] * 9,
        out_specs=vmem,
    )(x_tm,
      fused_params["wih0"], fused_params["whh0"], fused_params["b0"],
      fused_params["wih1"], fused_params["whh1"], fused_params["b1"],
      fused_params["wfc"], fused_params["bfc"])
    return jnp.transpose(out.reshape(T, B, 1), (1, 0, 2))   # (B, T, 1)


# ---------------------------- Pure-JAX reference ---------------------------- #

def _ref_lstm_dir(x_tbd, w_ih, w_hh, b_ih, b_hh):
    H = w_hh.shape[1]
    B = x_tbd.shape[1]

    def step(carry, x_t):
        h, c = carry
        gates = x_t @ w_ih.T + h @ w_hh.T + b_ih + b_hh
        i, f, g, o = jnp.split(gates, 4, axis=-1)
        i, f, o = jax.nn.sigmoid(i), jax.nn.sigmoid(f), jax.nn.sigmoid(o)
        g = jnp.tanh(g)
        c = f * c + i * g
        h = o * jnp.tanh(c)
        return (h, c), h

    init = (jnp.zeros((B, H), jnp.float32), jnp.zeros((B, H), jnp.float32))
    _, hs = lax.scan(step, init, x_tbd)
    return hs


def ref_forward(params, x_btd):
    x = jnp.transpose(x_btd, (1, 0, 2))
    layer_in = x
    for layer in range(2):
        p = params[f"l{layer}"]
        h_f = _ref_lstm_dir(layer_in, p["w_ih"], p["w_hh"], p["b_ih"], p["b_hh"])
        h_b = _ref_lstm_dir(layer_in[::-1], p["w_ih_rev"], p["w_hh_rev"],
                            p["b_ih_rev"], p["b_hh_rev"])[::-1]
        layer_in = jnp.concatenate([h_f, h_b], axis=-1)
    y = jnp.transpose(layer_in, (1, 0, 2))
    return y @ params["fc1_w"].T + params["fc1_b"]


# ---------------------------------- Main ------------------------------------ #

if __name__ == "__main__":
    B, T, D, H = 2, 8, 16, 32   # batch, seq, in_features, hidden_features
    key = jax.random.PRNGKey(0)
    pkey, xkey = jax.random.split(key)
    params = init_params(pkey, D, H)
    fused = prepare_fused_params(params)        # one-time weight re-layout
    x = jax.random.normal(xkey, (B, T, D), jnp.float32)

    out = jax.jit(lstm_ff_forward)(fused, x)
    jax.block_until_ready(out)

    ref = ref_forward(params, x)
    assert out.shape == (B, T, 1), out.shape
    assert jnp.allclose(out, ref, rtol=1e-3, atol=1e-3), float(
        jnp.max(jnp.abs(out - ref)))
    print("KERNEL_OK")
</pallas_src>

<mosaic_0001>
module attributes {stable_mosaic.version = 11 : i64} {
  func.func @_lstm_ff_fused_kernel(%arg0: memref<16x16xf32, #tpu.memory_space<vmem>>, %arg1: memref<16x256xf32, #tpu.memory_space<vmem>>, %arg2: memref<64x256xf32, #tpu.memory_space<vmem>>, %arg3: memref<1x256xf32, #tpu.memory_space<vmem>>, %arg4: memref<64x256xf32, #tpu.memory_space<vmem>>, %arg5: memref<64x256xf32, #tpu.memory_space<vmem>>, %arg6: memref<1x256xf32, #tpu.memory_space<vmem>>, %arg7: memref<1x64xf32, #tpu.memory_space<vmem>>, %arg8: memref<1x1xf32, #tpu.memory_space<vmem>>, %arg9: memref<16x1xf32, #tpu.memory_space<vmem>>) attributes {dimension_semantics = [], scalar_prefetch = 0 : i64, scratch_operands = 0 : i64, tpu.core_type = #tpu.core_type<tc>} {
    %0 = tpu.iota {dimensions = array<i32: 1>} : vector<2x256xi32>
    %c128_i32 = arith.constant 128 : i32
    %c0_i32 = arith.constant 0 : i32
    %1 = arith.cmpi eq, %c128_i32, %c0_i32 : i32
    %c1_i32 = arith.constant 1 : i32
    %2 = arith.select %1, %c1_i32, %c128_i32 : i32
    %3 = vector.broadcast %2 : i32 to vector<2x256xi32>
    %4 = arith.remsi %0, %3 : vector<2x256xi32>
    %c0_i32_0 = arith.constant 0 : i32
    %5 = vector.broadcast %c0_i32_0 : i32 to vector<2x256xi32>
    %6 = arith.cmpi ne, %4, %5 : vector<2x256xi32>
    %c0_i32_1 = arith.constant 0 : i32
    %7 = vector.broadcast %c0_i32_1 : i32 to vector<2x256xi32>
    %8 = arith.cmpi slt, %4, %7 : vector<2x256xi32>
    %c0_i32_2 = arith.constant 0 : i32
    %9 = arith.cmpi slt, %2, %c0_i32_2 : i32
    %10 = vector.broadcast %9 : i1 to vector<2x256xi1>
    %11 = vector.broadcast %10 : vector<2x256xi1> to vector<2x256xi1>
    %12 = arith.xori %8, %11 : vector<2x256xi1>
    %13 = arith.andi %12, %6 : vector<2x256xi1>
    %14 = vector.broadcast %2 : i32 to vector<2x256xi32>
    %15 = arith.addi %4, %14 : vector<2x256xi32>
    %16 = arith.select %13, %15, %4 : vector<2x256xi1>, vector<2x256xi32>
    %c64_i32 = arith.constant 64 : i32
    %17 = vector.broadcast %c64_i32 : i32 to vector<2x256xi32>
    %18 = arith.cmpi sge, %16, %17 : vector<2x256xi32>
    %c128_i32_3 = arith.constant 128 : i32
    %c0_i32_4 = arith.constant 0 : i32
    %19 = arith.cmpi eq, %c128_i32_3, %c0_i32_4 : i32
    %c1_i32_5 = arith.constant 1 : i32
    %20 = arith.select %19, %c1_i32_5, %c128_i32_3 : i32
    %21 = vector.broadcast %20 : i32 to vector<2x256xi32>
    %22 = arith.remsi %0, %21 : vector<2x256xi32>
    %c0_i32_6 = arith.constant 0 : i32
    %23 = vector.broadcast %c0_i32_6 : i32 to vector<2x256xi32>
    %24 = arith.cmpi ne, %22, %23 : vector<2x256xi32>
    %c0_i32_7 = arith.constant 0 : i32
    %25 = vector.broadcast %c0_i32_7 : i32 to vector<2x256xi32>
    %26 = arith.cmpi slt, %22, %25 : vector<2x256xi32>
    %c0_i32_8 = arith.constant 0 : i32
    %27 = arith.cmpi slt, %20, %c0_i32_8 : i32
    %28 = vector.broadcast %27 : i1 to vector<2x256xi1>
    %29 = vector.broadcast %28 : vector<2x256xi1> to vector<2x256xi1>
    %30 = arith.xori %26, %29 : vector<2x256xi1>
    %31 = arith.andi %30, %24 : vector<2x256xi1>
    %32 = vector.broadcast %20 : i32 to vector<2x256xi32>
    %33 = arith.addi %22, %32 : vector<2x256xi32>
    %34 = arith.select %31, %33, %22 : vector<2x256xi1>, vector<2x256xi32>
    %c96_i32 = arith.constant 96 : i32
    %35 = vector.broadcast %c96_i32 : i32 to vector<2x256xi32>
    %36 = arith.cmpi slt, %34, %35 : vector<2x256xi32>
    %37 = arith.andi %18, %36 : vector<2x256xi1>
    %c0 = arith.constant 0 : index
    %c0_9 = arith.constant 0 : index
    %38 = vector.load %arg0[%c0, %c0_9] : memref<16x16xf32, #tpu.memory_space<vmem>>, vector<16x16xf32>
    %c0_10 = arith.constant 0 : index
    %c0_11 = arith.constant 0 : index
    %39 = vector.load %arg1[%c0_10, %c0_11] : memref<16x256xf32, #tpu.memory_space<vmem>>, vector<16x256xf32>
    %c0_12 = arith.constant 0 : index
    %c0_13 = arith.constant 0 : index
    %40 = vector.load %arg2[%c0_12, %c0_13] : memref<64x256xf32, #tpu.memory_space<vmem>>, vector<64x256xf32>
    %c0_14 = arith.constant 0 : index
    %c0_15 = arith.constant 0 : index
    %41 = vector.load %arg3[%c0_14, %c0_15] : memref<1x256xf32, #tpu.memory_space<vmem>>, vector<1x256xf32>
    %cst = arith.constant dense<0.000000e+00> : vector<16x256xf32>
    %42 = tpu.matmul %38, %39, %cst {dimension_numbers = #tpu.dot_dimension_numbers<[1], [0], [0], [1], [0, 0, 1, 1], [], []>} : vector<16x16xf32>, vector<16x256xf32>, vector<16x256xf32> -> vector<16x256xf32>
    %43 = vector.broadcast %41 : vector<1x256xf32> to vector<16x256xf32>
    %44 = arith.addf %42, %43 : vector<16x256xf32>
    %cst_16 = arith.constant 0.000000e+00 : f32
    %45 = vector.broadcast %cst_16 : f32 to vector<2x64xf32>
    %cst_17 = arith.constant 0.000000e+00 : f32
    %46 = vector.broadcast %cst_17 : f32 to vector<2x64xf32>
    %47 = vector.extract_strided_slice %44 {offsets = [0, 0], sizes = [2, 128], strides = [1, 1]} : vector<16x256xf32> to vector<2x128xf32>
    %48 = vector.extract_strided_slice %44 {offsets = [14, 128], sizes = [2, 128], strides = [1, 1]} : vector<16x256xf32> to vector<2x128xf32>
    %49 = tpu.concatenate %47, %48 in 1 : vector<2x128xf32>, vector<2x128xf32> -> vector<2x256xf32>
    %cst_18 = arith.constant dense<0.000000e+00> : vector<2x256xf32>
    %50 = tpu.matmul %45, %40, %cst_18 {dimension_numbers = #tpu.dot_dimension_numbers<[1], [0], [0], [1], [0, 0, 1, 1], [], []>} : vector<2x64xf32>, vector<64x256xf32>, vector<2x256xf32> -> vector<2x256xf32>
    %51 = arith.addf %49, %50 : vector<2x256xf32>
    %52 = math.tanh %51 : vector<2x256xf32>
    %53 = arith.negf %51 : vector<2x256xf32>
    %54 = math.exp %53 : vector<2x256xf32>
    %cst_19 = arith.constant 1.000000e+00 : f32
    %55 = vector.broadcast %cst_19 : f32 to vector<2x256xf32>
    %56 = arith.addf %55, %54 : vector<2x256xf32>
    %57 = arith.divf %55, %56 : vector<2x256xf32>
    %58 = arith.select %37, %52, %57 : vector<2x256xi1>, vector<2x256xf32>
    %59 = vector.extract_strided_slice %58 {offsets = [0, 0], sizes = [2, 32], strides = [1, 1]} : vector<2x256xf32> to vector<2x32xf32>
    %60 = vector.extract_strided_slice %58 {offsets = [0, 128], sizes = [2, 32], strides = [1, 1]} : vector<2x256xf32> to vector<2x32xf32>
    %61 = tpu.concatenate %59, %60 in 1 : vector<2x32xf32>, vector<2x32xf32> -> vector<2x64xf32>
    %62 = vector.extract_strided_slice %58 {offsets = [0, 32], sizes = [2, 32], strides = [1, 1]} : vector<2x256xf32> to vector<2x32xf32>
    %63 = vector.extract_strided_slice %58 {offsets = [0, 160], sizes = [2, 32], strides = [1, 1]} : vector<2x256xf32> to vector<2x32xf32>
    %64 = tpu.concatenate %62, %63 in 1 : vector<2x32xf32>, vector<2x32xf32> -> vector<2x64xf32>
    %65 = vector.extract_strided_slice %58 {offsets = [0, 64], sizes = [2, 32], strides = [1, 1]} : vector<2x256xf32> to vector<2x32xf32>
    %66 = vector.extract_strided_slice %58 {offsets = [0, 192], sizes = [2, 32], strides = [1, 1]} : vector<2x256xf32> to vector<2x32xf32>
    %67 = tpu.concatenate %65, %66 in 1 : vector<2x32xf32>, vector<2x32xf32> -> vector<2x64xf32>
    %68 = vector.extract_strided_slice %58 {offsets = [0, 96], sizes = [2, 32], strides = [1, 1]} : vector<2x256xf32> to vector<2x32xf32>
    %69 = vector.extract_strided_slice %58 {offsets = [0, 224], sizes = [2, 32], strides = [1, 1]} : vector<2x256xf32> to vector<2x32xf32>
    %70 = tpu.concatenate %68, %69 in 1 : vector<2x32xf32>, vector<2x32xf32> -> vector<2x64xf32>
    %71 = arith.mulf %64, %46 : vector<2x64xf32>
    %72 = arith.mulf %61, %67 : vector<2x64xf32>
    %73 = arith.addf %71, %72 : vector<2x64xf32>
    %74 = math.tanh %73 : vector<2x64xf32>
    %75 = arith.mulf %70, %74 : vector<2x64xf32>
    %76 = vector.extract_strided_slice %75 {offsets = [0, 0], sizes = [2, 32], strides = [1, 1]} : vector<2x64xf32> to vector<2x32xf32>
    %77 = vector.extract_strided_slice %75 {offsets = [0, 32], sizes = [2, 32], strides = [1, 1]} : vector<2x64xf32> to vector<2x32xf32>
    %78 = vector.extract_strided_slice %44 {offsets = [2, 0], sizes = [2, 128], strides = [1, 1]} : vector<16x256xf32> to vector<2x128xf32>
    %79 = vector.extract_strided_slice %44 {offsets = [12, 128], sizes = [2, 128], strides = [1, 1]} : vector<16x256xf32> to vector<2x128xf32>
    %80 = tpu.concatenate %78, %79 in 1 : vector<2x128xf32>, vector<2x128xf32> -> vector<2x256xf32>
    %cst_20 = arith.constant dense<0.000000e+00> : vector<2x256xf32>
    %81 = tpu.matmul %75, %40, %cst_20 {dimension_numbers = #tpu.dot_dimension_numbers<[1], [0], [0], [1], [0, 0, 1, 1], [], []>} : vector<2x64xf32>, vector<64x256xf32>, vector<2x256xf32> -> vector<2x256xf32>
    %82 = arith.addf %80, %81 : vector<2x256xf32>
    %83 = math.tanh %82 : vector<2x256xf32>
    %84 = arith.negf %82 : vector<2x256xf32>
    %85 = math.exp %84 : vector<2x256xf32>
    %cst_21 = arith.constant 1.000000e+00 : f32
    %86 = vector.broadcast %cst_21 : f32 to vector<2x256xf32>
    %87 = arith.addf %86, %85 : vector<2x256xf32>
    %88 = arith.divf %86, %87 : vector<2x256xf32>
    %89 = arith.select %37, %83, %88 : vector<2x256xi1>, vector<2x256xf32>
    %90 = vector.extract_strided_slice %89 {offsets = [0, 0], sizes = [2, 32], strides = [1, 1]} : vector<2x256xf32> to vector<2x32xf32>
    %91 = vector.extract_strided_slice %89 {offsets = [0, 128], sizes = [2, 32], strides = [1, 1]} : vector<2x256xf32> to vector<2x32xf32>
    %92 = tpu.concatenate %90, %91 in 1 : vector<2x32xf32>, vector<2x32xf32> -> vector<2x64xf32>
    %93 = vector.extract_strided_slice %89 {offsets = [0, 32], sizes = [2, 32], strides = [1, 1]} : vector<2x256xf32> to vector<2x32xf32>
    %94 = vector.extract_strided_slice %89 {offsets = [0, 160], sizes = [2, 32], strides = [1, 1]} : vector<2x256xf32> to vector<2x32xf32>
    %95 = tpu.concatenate %93, %94 in 1 : vector<2x32xf32>, vector<2x32xf32> -> vector<2x64xf32>
    %96 = vector.extract_strided_slice %89 {offsets = [0, 64], sizes = [2, 32], strides = [1, 1]} : vector<2x256xf32> to vector<2x32xf32>
    %97 = vector.extract_strided_slice %89 {offsets = [0, 192], sizes = [2, 32], strides = [1, 1]} : vector<2x256xf32> to vector<2x32xf32>
    %98 = tpu.concatenate %96, %97 in 1 : vector<2x32xf32>, vector<2x32xf32> -> vector<2x64xf32>
    %99 = vector.extract_strided_slice %89 {offsets = [0, 96], sizes = [2, 32], strides = [1, 1]} : vector<2x256xf32> to vector<2x32xf32>
    %100 = vector.extract_strided_slice %89 {offsets = [0, 224], sizes = [2, 32], strides = [1, 1]} : vector<2x256xf32> to vector<2x32xf32>
    %101 = tpu.concatenate %99, %100 in 1 : vector<2x32xf32>, vector<2x32xf32> -> vector<2x64xf32>
    %102 = arith.mulf %95, %73 : vector<2x64xf32>
    %103 = arith.mulf %92, %98 : vector<2x64xf32>
    %104 = arith.addf %102, %103 : vector<2x64xf32>
    %105 = math.tanh %104 : vector<2x64xf32>
    %106 = arith.mulf %101, %105 : vector<2x64xf32>
    %107 = vector.extract_strided_slice %106 {offsets = [0, 0], sizes = [2, 32], strides = [1, 1]} : vector<2x64xf32> to vector<2x32xf32>
    %108 = vector.extract_strided_slice %106 {offsets = [0, 32], sizes = [2, 32], strides = [1, 1]} : vector<2x64xf32> to vector<2x32xf32>
    %109 = vector.extract_strided_slice %44 {offsets = [4, 0], sizes = [2, 128], strides = [1, 1]} : vector<16x256xf32> to vector<2x128xf32>
    %110 = vector.extract_strided_slice %44 {offsets = [10, 128], sizes = [2, 128], strides = [1, 1]} : vector<16x256xf32> to vector<2x128xf32>
    %111 = tpu.concatenate %109, %110 in 1 : vector<2x128xf32>, vector<2x128xf32> -> vector<2x256xf32>
    %cst_22 = arith.constant dense<0.000000e+00> : vector<2x256xf32>
    %112 = tpu.matmul %106, %40, %cst_22 {dimension_numbers = #tpu.dot_dimension_numbers<[1], [0], [0], [1], [0, 0, 1, 1], [], []>} : vector<2x64xf32>, vector<64x256xf32>, vector<2x256xf32> -> vector<2x256xf32>
    %113 = arith.addf %111, %112 : vector<2x256xf32>
    %114 = math.tanh %113 : vector<2x256xf32>
    %115 = arith.negf %113 : vector<2x256xf32>
    %116 = math.exp %115 : vector<2x256xf32>
    %cst_23 = arith.constant 1.000000e+00 : f32
    %117 = vector.broadcast %cst_23 : f32 to vector<2x256xf32>
    %118 = arith.addf %117, %116 : vector<2x256xf32>
    %119 = arith.divf %117, %118 : vector<2x256xf32>
    %120 = arith.select %37, %114, %119 : vector<2x256xi1>, vector<2x256xf32>
    %121 = vector.extract_strided_slice %120 {offsets = [0, 0], sizes = [2, 32], strides = [1, 1]} : vector<2x256xf32> to vector<2x32xf32>
    %122 = vector.extract_strided_slice %120 {offsets = [0, 128], sizes = [2, 32], strides = [1, 1]} : vector<2x256xf32> to vector<2x32xf32>
    %123 = tpu.concatenate %121, %122 in 1 : vector<2x32xf32>, vector<2x32xf32> -> vector<2x64xf32>
    %124 = vector.extract_strided_slice %120 {offsets = [0, 32], sizes = [2, 32], strides = [1, 1]} : vector<2x256xf32> to vector<2x32xf32>
    %125 = vector.extract_strided_slice %120 {offsets = [0, 160], sizes = [2, 32], strides = [1, 1]} : vector<2x256xf32> to vector<2x32xf32>
    %126 = tpu.concatenate %124, %125 in 1 : vector<2x32xf32>, vector<2x32xf32> -> vector<2x64xf32>
    %127 = vector.extract_strided_slice %120 {offsets = [0, 64], sizes = [2, 32], strides = [1, 1]} : vector<2x256xf32> to vector<2x32xf32>
    %128 = vector.extract_strided_slice %120 {offsets = [0, 192], sizes = [2, 32], strides = [1, 1]} : vector<2x256xf32> to vector<2x32xf32>
    %129 = tpu.concatenate %127, %128 in 1 : vector<2x32xf32>, vector<2x32xf32> -> vector<2x64xf32>
    %130 = vector.extract_strided_slice %120 {offsets = [0, 96], sizes = [2, 32], strides = [1, 1]} : vector<2x256xf32> to vector<2x32xf32>
    %131 = vector.extract_strided_slice %120 {offsets = [0, 224], sizes = [2, 32], strides = [1, 1]} : vector<2x256xf32> to vector<2x32xf32>
    %132 = tpu.concatenate %130, %131 in 1 : vector<2x32xf32>, vector<2x32xf32> -> vector<2x64xf32>
    %133 = arith.mulf %126, %104 : vector<2x64xf32>
    %134 = arith.mulf %123, %129 : vector<2x64xf32>
    %135 = arith.addf %133, %134 : vector<2x64xf32>
    %136 = math.tanh %135 : vector<2x64xf32>
    %137 = arith.mulf %132, %136 : vector<2x64xf32>
    %138 = vector.extract_strided_slice %137 {offsets = [0, 0], sizes = [2, 32], strides = [1, 1]} : vector<2x64xf32> to vector<2x32xf32>
    %139 = vector.extract_strided_slice %137 {offsets = [0, 32], sizes = [2, 32], strides = [1, 1]} : vector<2x64xf32> to vector<2x32xf32>
    %140 = vector.extract_strided_slice %44 {offsets = [6, 0], sizes = [2, 128], strides = [1, 1]} : vector<16x256xf32> to vector<2x128xf32>
    %141 = vector.extract_strided_slice %44 {offsets = [8, 128], sizes = [2, 128], strides = [1, 1]} : vector<16x256xf32> to vector<2x128xf32>
    %142 = tpu.concatenate %140, %141 in 1 : vector<2x128xf32>, vector<2x128xf32> -> vector<2x256xf32>
    %cst_24 = arith.constant dense<0.000000e+00> : vector<2x256xf32>
    %143 = tpu.matmul %137, %40, %cst_24 {dimension_numbers = #tpu.dot_dimension_numbers<[1], [0], [0], [1], [0, 0, 1, 1], [], []>} : vector<2x64xf32>, vector<64x256xf32>, vector<2x256xf32> -> vector<2x256xf32>
    %144 = arith.addf %142, %143 : vector<2x256xf32>
    %145 = math.tanh %144 : vector<2x256xf32>
    %146 = arith.negf %144 : vector<2x256xf32>
    %147 = math.exp %146 : vector<2x256xf32>
    %cst_25 = arith.constant 1.000000e+00 : f32
    %148 = vector.broadcast %cst_25 : f32 to vector<2x256xf32>
    %149 = arith.addf %148, %147 : vector<2x256xf32>
    %150 = arith.divf %148, %149 : vector<2x256xf32>
    %151 = arith.select %37, %145, %150 : vector<2x256xi1>, vector<2x256xf32>
    %152 = vector.extract_strided_slice %151 {offsets = [0, 0], sizes = [2, 32], strides = [1, 1]} : vector<2x256xf32> to vector<2x32xf32>
    %153 = vector.extract_strided_slice %151 {offsets = [0, 128], sizes = [2, 32], strides = [1, 1]} : vector<2x256xf32> to vector<2x32xf32>
    %154 = tpu.concatenate %152, %153 in 1 : vector<2x32xf32>, vector<2x32xf32> -> vector<2x64xf32>
    %155 = vector.extract_strided_slice %151 {offsets = [0, 32], sizes = [2, 32], strides = [1, 1]} : vector<2x256xf32> to vector<2x32xf32>
    %156 = vector.extract_strided_slice %151 {offsets = [0, 160], sizes = [2, 32], strides = [1, 1]} : vector<2x256xf32> to vector<2x32xf32>
    %157 = tpu.concatenate %155, %156 in 1 : vector<2x32xf32>, vector<2x32xf32> -> vector<2x64xf32>
    %158 = vector.extract_strided_slice %151 {offsets = [0, 64], sizes = [2, 32], strides = [1, 1]} : vector<2x256xf32> to vector<2x32xf32>
    %159 = vector.extract_strided_slice %151 {offsets = [0, 192], sizes = [2, 32], strides = [1, 1]} : vector<2x256xf32> to vector<2x32xf32>
    %160 = tpu.concatenate %158, %159 in 1 : vector<2x32xf32>, vector<2x32xf32> -> vector<2x64xf32>
    %161 = vector.extract_strided_slice %151 {offsets = [0, 96], sizes = [2, 32], strides = [1, 1]} : vector<2x256xf32> to vector<2x32xf32>
    %162 = vector.extract_strided_slice %151 {offsets = [0, 224], sizes = [2, 32], strides = [1, 1]} : vector<2x256xf32> to vector<2x32xf32>
    %163 = tpu.concatenate %161, %162 in 1 : vector<2x32xf32>, vector<2x32xf32> -> vector<2x64xf32>
    %164 = arith.mulf %157, %135 : vector<2x64xf32>
    %165 = arith.mulf %154, %160 : vector<2x64xf32>
    %166 = arith.addf %164, %165 : vector<2x64xf32>
    %167 = math.tanh %166 : vector<2x64xf32>
    %168 = arith.mulf %163, %167 : vector<2x64xf32>
    %169 = vector.extract_strided_slice %168 {offsets = [0, 0], sizes = [2, 32], strides = [1, 1]} : vector<2x64xf32> to vector<2x32xf32>
    %170 = vector.extract_strided_slice %168 {offsets = [0, 32], sizes = [2, 32], strides = [1, 1]} : vector<2x64xf32> to vector<2x32xf32>
    %171 = vector.extract_strided_slice %44 {offsets = [8, 0], sizes = [2, 128], strides = [1, 1]} : vector<16x256xf32> to vector<2x128xf32>
    %172 = vector.extract_strided_slice %44 {offsets = [6, 128], sizes = [2, 128], strides = [1, 1]} : vector<16x256xf32> to vector<2x128xf32>
    %173 = tpu.concatenate %171, %172 in 1 : vector<2x128xf32>, vector<2x128xf32> -> vector<2x256xf32>
    %cst_26 = arith.constant dense<0.000000e+00> : vector<2x256xf32>
    %174 = tpu.matmul %168, %40, %cst_26 {dimension_numbers = #tpu.dot_dimension_numbers<[1], [0], [0], [1], [0, 0, 1, 1], [], []>} : vector<2x64xf32>, vector<64x256xf32>, vector<2x256xf32> -> vector<2x256xf32>
    %175 = arith.addf %173, %174 : vector<2x256xf32>
    %176 = math.tanh %175 : vector<2x256xf32>
    %177 = arith.negf %175 : vector<2x256xf32>
    %178 = math.exp %177 : vector<2x256xf32>
    %cst_27 = arith.constant 1.000000e+00 : f32
    %179 = vector.broadcast %cst_27 : f32 to vector<2x256xf32>
    %180 = arith.addf %179, %178 : vector<2x256xf32>
    %181 = arith.divf %179, %180 : vector<2x256xf32>
    %182 = arith.select %37, %176, %181 : vector<2x256xi1>, vector<2x256xf32>
    %183 = vector.extract_strided_slice %182 {offsets = [0, 0], sizes = [2, 32], strides = [1, 1]} : vector<2x256xf32> to vector<2x32xf32>
    %184 = vector.extract_strided_slice %182 {offsets = [0, 128], sizes = [2, 32], strides = [1, 1]} : vector<2x256xf32> to vector<2x32xf32>
    %185 = tpu.concatenate %183, %184 in 1 : vector<2x32xf32>, vector<2x32xf32> -> vector<2x64xf32>
    %186 = vector.extract_strided_slice %182 {offsets = [0, 32], sizes = [2, 32], strides = [1, 1]} : vector<2x256xf32> to vector<2x32xf32>
    %187 = vector.extract_strided_slice %182 {offsets = [0, 160], sizes = [2, 32], strides = [1, 1]} : vector<2x256xf32> to vector<2x32xf32>
    %188 = tpu.concatenate %186, %187 in 1 : vector<2x32xf32>, vector<2x32xf32> -> vector<2x64xf32>
    %189 = vector.extract_strided_slice %182 {offsets = [0, 64], sizes = [2, 32], strides = [1, 1]} : vector<2x256xf32> to vector<2x32xf32>
    %190 = vector.extract_strided_slice %182 {offsets = [0, 192], sizes = [2, 32], strides = [1, 1]} : vector<2x256xf32> to vector<2x32xf32>
    %191 = tpu.concatenate %189, %190 in 1 : vector<2x32xf32>, vector<2x32xf32> -> vector<2x64xf32>
    %192 = vector.extract_strided_slice %182 {offsets = [0, 96], sizes = [2, 32], strides = [1, 1]} : vector<2x256xf32> to vector<2x32xf32>
    %193 = vector.extract_strided_slice %182 {offsets = [0, 224], sizes = [2, 32], strides = [1, 1]} : vector<2x256xf32> to vector<2x32xf32>
    %194 = tpu.concatenate %192, %193 in 1 : vector<2x32xf32>, vector<2x32xf32> -> vector<2x64xf32>
    %195 = arith.mulf %188, %166 : vector<2x64xf32>
    %196 = arith.mulf %185, %191 : vector<2x64xf32>
    %197 = arith.addf %195, %196 : vector<2x64xf32>
    %198 = math.tanh %197 : vector<2x64xf32>
    %199 = arith.mulf %194, %198 : vector<2x64xf32>
    %200 = vector.extract_strided_slice %199 {offsets = [0, 0], sizes = [2, 32], strides = [1, 1]} : vector<2x64xf32> to vector<2x32xf32>
    %201 = vector.extract_strided_slice %199 {offsets = [0, 32], sizes = [2, 32], strides = [1, 1]} : vector<2x64xf32> to vector<2x32xf32>
    %202 = vector.extract_strided_slice %44 {offsets = [10, 0], sizes = [2, 128], strides = [1, 1]} : vector<16x256xf32> to vector<2x128xf32>
    %203 = vector.extract_strided_slice %44 {offsets = [4, 128], sizes = [2, 128], strides = [1, 1]} : vector<16x256xf32> to vector<2x128xf32>
    %204 = tpu.concatenate %202, %203 in 1 : vector<2x128xf32>, vector<2x128xf32> -> vector<2x256xf32>
    %cst_28 = arith.constant dense<0.000000e+00> : vector<2x256xf32>
    %205 = tpu.matmul %199, %40, %cst_28 {dimension_numbers = #tpu.dot_dimension_numbers<[1], [0], [0], [1], [0, 0, 1, 1], [], []>} : vector<2x64xf32>, vector<64x256xf32>, vector<2x256xf32> -> vector<2x256xf32>
    %206 = arith.addf %204, %205 : vector<2x256xf32>
    %207 = math.tanh %206 : vector<2x256xf32>
    %208 = arith.negf %206 : vector<2x256xf32>
    %209 = math.exp %208 : vector<2x256xf32>
    %cst_29 = arith.constant 1.000000e+00 : f32
    %210 = vector.broadcast %cst_29 : f32 to vector<2x256xf32>
    %211 = arith.addf %210, %209 : vector<2x256xf32>
    %212 = arith.divf %210, %211 : vector<2x256xf32>
    %213 = arith.select %37, %207, %212 : vector<2x256xi1>, vector<2x256xf32>
    %214 = vector.extract_strided_slice %213 {offsets = [0, 0], sizes = [2, 32], strides = [1, 1]} : vector<2x256xf32> to vector<2x32xf32>
    %215 = vector.extract_strided_slice %213 {offsets = [0, 128], sizes = [2, 32], strides = [1, 1]} : vector<2x256xf32> to vector<2x32xf32>
    %216 = tpu.concatenate %214, %215 in 1 : vector<2x32xf32>, vector<2x32xf32> -> vector<2x64xf32>
    %217 = vector.extract_strided_slice %213 {offsets = [0, 32], sizes = [2, 32], strides = [1, 1]} : vector<2x256xf32> to vector<2x32xf32>
    %218 = vector.extract_strided_slice %213 {offsets = [0, 160], sizes = [2, 32], strides = [1, 1]} : vector<2x256xf32> to vector<2x32xf32>
    %219 = tpu.concatenate %217, %218 in 1 : vector<2x32xf32>, vector<2x32xf32> -> vector<2x64xf32>
    %220 = vector.extract_strided_slice %213 {offsets = [0, 64], sizes = [2, 32], strides = [1, 1]} : vector<2x256xf32> to vector<2x32xf32>
    %221 = vector.extract_strided_slice %213 {offsets = [0, 192], sizes = [2, 32], strides = [1, 1]} : vector<2x256xf32> to vector<2x32xf32>
    %222 = tpu.concatenate %220, %221 in 1 : vector<2x32xf32>, vector<2x32xf32> -> vector<2x64xf32>
    %223 = vector.extract_strided_slice %213 {offsets = [0, 96], sizes = [2, 32], strides = [1, 1]} : vector<2x256xf32> to vector<2x32xf32>
    %224 = vector.extract_strided_slice %213 {offsets = [0, 224], sizes = [2, 32], strides = [1, 1]} : vector<2x256xf32> to vector<2x32xf32>
    %225 = tpu.concatenate %223, %224 in 1 : vector<2x32xf32>, vector<2x32xf32> -> vector<2x64xf32>
    %226 = arith.mulf %219, %197 : vector<2x64xf32>
    %227 = arith.mulf %216, %222 : vector<2x64xf32>
    %228 = arith.addf %226, %227 : vector<2x64xf32>
    %229 = math.tanh %228 : vector<2x64xf32>
    %230 = arith.mulf %225, %229 : vector<2x64xf32>
    %231 = vector.extract_strided_slice %230 {offsets = [0, 0], sizes = [2, 32], strides = [1, 1]} : vector<2x64xf32> to vector<2x32xf32>
    %232 = vector.extract_strided_slice %230 {offsets = [0, 32], sizes = [2, 32], strides = [1, 1]} : vector<2x64xf32> to vector<2x32xf32>
    %233 = vector.extract_strided_slice %44 {offsets = [12, 0], sizes = [2, 128], strides = [1, 1]} : vector<16x256xf32> to vector<2x128xf32>
    %234 = vector.extract_strided_slice %44 {offsets = [2, 128], sizes = [2, 128], strides = [1, 1]} : vector<16x256xf32> to vector<2x128xf32>
    %235 = tpu.concatenate %233, %234 in 1 : vector<2x128xf32>, vector<2x128xf32> -> vector<2x256xf32>
    %cst_30 = arith.constant dense<0.000000e+00> : vector<2x256xf32>
    %236 = tpu.matmul %230, %40, %cst_30 {dimension_numbers = #tpu.dot_dimension_numbers<[1], [0], [0], [1], [0, 0, 1, 1], [], []>} : vector<2x64xf32>, vector<64x256xf32>, vector<2x256xf32> -> vector<2x256xf32>
    %237 = arith.addf %235, %236 : vector<2x256xf32>
    %238 = math.tanh %237 : vector<2x256xf32>
    %239 = arith.negf %237 : vector<2x256xf32>
    %240 = math.exp %239 : vector<2x256xf32>
    %cst_31 = arith.constant 1.000000e+00 : f32
    %241 = vector.broadcast %cst_31 : f32 to vector<2x256xf32>
    %242 = arith.addf %241, %240 : vector<2x256xf32>
    %243 = arith.divf %241, %242 : vector<2x256xf32>
    %244 = arith.select %37, %238, %243 : vector<2x256xi1>, vector<2x256xf32>
    %245 = vector.extract_strided_slice %244 {offsets = [0, 0], sizes = [2, 32], strides = [1, 1]} : vector<2x256xf32> to vector<2x32xf32>
    %246 = vector.extract_strided_slice %244 {offsets = [0, 128], sizes = [2, 32], strides = [1, 1]} : vector<2x256xf32> to vector<2x32xf32>
    %247 = tpu.concatenate %245, %246 in 1 : vector<2x32xf32>, vector<2x32xf32> -> vector<2x64xf32>
    %248 = vector.extract_strided_slice %244 {offsets = [0, 32], sizes = [2, 32], strides = [1, 1]} : vector<2x256xf32> to vector<2x32xf32>
    %249 = vector.extract_strided_slice %244 {offsets = [0, 160], sizes = [2, 32], strides = [1, 1]} : vector<2x256xf32> to vector<2x32xf32>
    %250 = tpu.concatenate %248, %249 in 1 : vector<2x32xf32>, vector<2x32xf32> -> vector<2x64xf32>
    %251 = vector.extract_strided_slice %244 {offsets = [0, 64], sizes = [2, 32], strides = [1, 1]} : vector<2x256xf32> to vector<2x32xf32>
    %252 = vector.extract_strided_slice %244 {offsets = [0, 192], sizes = [2, 32], strides = [1, 1]} : vector<2x256xf32> to vector<2x32xf32>
    %253 = tpu.concatenate %251, %252 in 1 : vector<2x32xf32>, vector<2x32xf32> -> vector<2x64xf32>
    %254 = vector.extract_strided_slice %244 {offsets = [0, 96], sizes = [2, 32], strides = [1, 1]} : vector<2x256xf32> to vector<2x32xf32>
    %255 = vector.extract_strided_slice %244 {offsets = [0, 224], sizes = [2, 32], strides = [1, 1]} : vector<2x256xf32> to vector<2x32xf32>
    %256 = tpu.concatenate %254, %255 in 1 : vector<2x32xf32>, vector<2x32xf32> -> vector<2x64xf32>
    %257 = arith.mulf %250, %228 : vector<2x64xf32>
    %258 = arith.mulf %247, %253 : vector<2x64xf32>
    %259 = arith.addf %257, %258 : vector<2x64xf32>
    %260 = math.tanh %259 : vector<2x64xf32>
    %261 = arith.mulf %256, %260 : vector<2x64xf32>
    %262 = vector.extract_strided_slice %261 {offsets = [0, 0], sizes = [2, 32], strides = [1, 1]} : vector<2x64xf32> to vector<2x32xf32>
    %263 = vector.extract_strided_slice %261 {offsets = [0, 32], sizes = [2, 32], strides = [1, 1]} : vector<2x64xf32> to vector<2x32xf32>
    %264 = vector.extract_strided_slice %44 {offsets = [14, 0], sizes = [2, 128], strides = [1, 1]} : vector<16x256xf32> to vector<2x128xf32>
    %265 = vector.extract_strided_slice %44 {offsets = [0, 128], sizes = [2, 128], strides = [1, 1]} : vector<16x256xf32> to vector<2x128xf32>
    %266 = tpu.concatenate %264, %265 in 1 : vector<2x128xf32>, vector<2x128xf32> -> vector<2x256xf32>
    %cst_32 = arith.constant dense<0.000000e+00> : vector<2x256xf32>
    %267 = tpu.matmul %261, %40, %cst_32 {dimension_numbers = #tpu.dot_dimension_numbers<[1], [0], [0], [1], [0, 0, 1, 1], [], []>} : vector<2x64xf32>, vector<64x256xf32>, vector<2x256xf32> -> vector<2x256xf32>
    %268 = arith.addf %266, %267 : vector<2x256xf32>
    %269 = math.tanh %268 : vector<2x256xf32>
    %270 = arith.negf %268 : vector<2x256xf32>
    %271 = math.exp %270 : vector<2x256xf32>
    %cst_33 = arith.constant 1.000000e+00 : f32
    %272 = vector.broadcast %cst_33 : f32 to vector<2x256xf32>
    %273 = arith.addf %272, %271 : vector<2x256xf32>
    %274 = arith.divf %272, %273 : vector<2x256xf32>
    %275 = arith.select %37, %269, %274 : vector<2x256xi1>, vector<2x256xf32>
    %276 = vector.extract_strided_slice %275 {offsets = [0, 0], sizes = [2, 32], strides = [1, 1]} : vector<2x256xf32> to vector<2x32xf32>
    %277 = vector.extract_strided_slice %275 {offsets = [0, 128], sizes = [2, 32], strides = [1, 1]} : vector<2x256xf32> to vector<2x32xf32>
    %278 = tpu.concatenate %276, %277 in 1 : vector<2x32xf32>, vector<2x32xf32> -> vector<2x64xf32>
    %279 = vector.extract_strided_slice %275 {offsets = [0, 32], sizes = [2, 32], strides = [1, 1]} : vector<2x256xf32> to vector<2x32xf32>
    %280 = vector.extract_strided_slice %275 {offsets = [0, 160], sizes = [2, 32], strides = [1, 1]} : vector<2x256xf32> to vector<2x32xf32>
    %281 = tpu.concatenate %279, %280 in 1 : vector<2x32xf32>, vector<2x32xf32> -> vector<2x64xf32>
    %282 = vector.extract_strided_slice %275 {offsets = [0, 64], sizes = [2, 32], strides = [1, 1]} : vector<2x256xf32> to vector<2x32xf32>
    %283 = vector.extract_strided_slice %275 {offsets = [0, 192], sizes = [2, 32], strides = [1, 1]} : vector<2x256xf32> to vector<2x32xf32>
    %284 = tpu.concatenate %282, %283 in 1 : vector<2x32xf32>, vector<2x32xf32> -> vector<2x64xf32>
    %285 = vector.extract_strided_slice %275 {offsets = [0, 96], sizes = [2, 32], strides = [1, 1]} : vector<2x256xf32> to vector<2x32xf32>
    %286 = vector.extract_strided_slice %275 {offsets = [0, 224], sizes = [2, 32], strides = [1, 1]} : vector<2x256xf32> to vector<2x32xf32>
    %287 = tpu.concatenate %285, %286 in 1 : vector<2x32xf32>, vector<2x32xf32> -> vector<2x64xf32>
    %288 = arith.mulf %281, %259 : vector<2x64xf32>
    %289 = arith.mulf %278, %284 : vector<2x64xf32>
    %290 = arith.addf %288, %289 : vector<2x64xf32>
    %291 = math.tanh %290 : vector<2x64xf32>
    %292 = arith.mulf %287, %291 : vector<2x64xf32>
    %293 = vector.extract_strided_slice %292 {offsets = [0, 0], sizes = [2, 32], strides = [1, 1]} : vector<2x64xf32> to vector<2x32xf32>
    %294 = vector.extract_strided_slice %292 {offsets = [0, 32], sizes = [2, 32], strides = [1, 1]} : vector<2x64xf32> to vector<2x32xf32>
    %295 = tpu.concatenate %76, %294 in 1 : vector<2x32xf32>, vector<2x32xf32> -> vector<2x64xf32>
    %296 = tpu.concatenate %107, %263 in 1 : vector<2x32xf32>, vector<2x32xf32> -> vector<2x64xf32>
    %297 = tpu.concatenate %138, %232 in 1 : vector<2x32xf32>, vector<2x32xf32> -> vector<2x64xf32>
    %298 = tpu.concatenate %169, %201 in 1 : vector<2x32xf32>, vector<2x32xf32> -> vector<2x64xf32>
    %299 = tpu.concatenate %200, %170 in 1 : vector<2x32xf32>, vector<2x32xf32> -> vector<2x64xf32>
    %300 = tpu.concatenate %231, %139 in 1 : vector<2x32xf32>, vector<2x32xf32> -> vector<2x64xf32>
    %301 = tpu.concatenate %262, %108 in 1 : vector<2x32xf32>, vector<2x32xf32> -> vector<2x64xf32>
    %302 = tpu.concatenate %293, %77 in 1 : vector<2x32xf32>, vector<2x32xf32> -> vector<2x64xf32>
    %303 = tpu.concatenate %295, %296, %297, %298, %299, %300, %301, %302 in 0 : vector<2x64xf32>, vector<2x64xf32>, vector<2x64xf32>, vector<2x64xf32>, vector<2x64xf32>, vector<2x64xf32>, vector<2x64xf32>, vector<2x64xf32> -> vector<16x64xf32>
    %c0_34 = arith.constant 0 : index
    %c0_35 = arith.constant 0 : index
    %304 = vector.load %arg4[%c0_34, %c0_35] : memref<64x256xf32, #tpu.memory_space<vmem>>, vector<64x256xf32>
    %c0_36 = arith.constant 0 : index
    %c0_37 = arith.constant 0 : index
    %305 = vector.load %arg5[%c0_36, %c0_37] : memref<64x256xf32, #tpu.memory_space<vmem>>, vector<64x256xf32>
    %c0_38 = arith.constant 0 : index
    %c0_39 = arith.constant 0 : index
    %306 = vector.load %arg6[%c0_38, %c0_39] : memref<1x256xf32, #tpu.memory_space<vmem>>, vector<1x256xf32>
    %cst_40 = arith.constant dense<0.000000e+00> : vector<16x256xf32>
    %307 = tpu.matmul %303, %304, %cst_40 {dimension_numbers = #tpu.dot_dimension_numbers<[1], [0], [0], [1], [0, 0, 1, 1], [], []>} : vector<16x64xf32>, vector<64x256xf32>, vector<16x256xf32> -> vector<16x256xf32>
    %308 = vector.broadcast %306 : vector<1x256xf32> to vector<16x256xf32>
    %309 = arith.addf %307, %308 : vector<16x256xf32>
    %cst_41 = arith.constant 0.000000e+00 : f32
    %310 = vector.broadcast %cst_41 : f32 to vector<2x64xf32>
    %cst_42 = arith.constant 0.000000e+00 : f32
    %311 = vector.broadcast %cst_42 : f32 to vector<2x64xf32>
    %312 = vector.extract_strided_slice %309 {offsets = [0, 0], sizes = [2, 128], strides = [1, 1]} : vector<16x256xf32> to vector<2x128xf32>
    %313 = vector.extract_strided_slice %309 {offsets = [14, 128], sizes = [2, 128], strides = [1, 1]} : vector<16x256xf32> to vector<2x128xf32>
    %314 = tpu.concatenate %312, %313 in 1 : vector<2x128xf32>, vector<2x128xf32> -> vector<2x256xf32>
    %cst_43 = arith.constant dense<0.000000e+00> : vector<2x256xf32>
    %315 = tpu.matmul %310, %305, %cst_43 {dimension_numbers = #tpu.dot_dimension_numbers<[1], [0], [0], [1], [0, 0, 1, 1], [], []>} : vector<2x64xf32>, vector<64x256xf32>, vector<2x256xf32> -> vector<2x256xf32>
    %316 = arith.addf %314, %315 : vector<2x256xf32>
    %317 = math.tanh %316 : vector<2x256xf32>
    %318 = arith.negf %316 : vector<2x256xf32>
    %319 = math.exp %318 : vector<2x256xf32>
    %cst_44 = arith.constant 1.000000e+00 : f32
    %320 = vector.broadcast %cst_44 : f32 to vector<2x256xf32>
    %321 = arith.addf %320, %319 : vector<2x256xf32>
    %322 = arith.divf %320, %321 : vector<2x256xf32>
    %323 = arith.select %37, %317, %322 : vector<2x256xi1>, vector<2x256xf32>
    %324 = vector.extract_strided_slice %323 {offsets = [0, 0], sizes = [2, 32], strides = [1, 1]} : vector<2x256xf32> to vector<2x32xf32>
    %325 = vector.extract_strided_slice %323 {offsets = [0, 128], sizes = [2, 32], strides = [1, 1]} : vector<2x256xf32> to vector<2x32xf32>
    %326 = tpu.concatenate %324, %325 in 1 : vector<2x32xf32>, vector<2x32xf32> -> vector<2x64xf32>
    %327 = vector.extract_strided_slice %323 {offsets = [0, 32], sizes = [2, 32], strides = [1, 1]} : vector<2x256xf32> to vector<2x32xf32>
    %328 = vector.extract_strided_slice %323 {offsets = [0, 160], sizes = [2, 32], strides = [1, 1]} : vector<2x256xf32> to vector<2x32xf32>
    %329 = tpu.concatenate %327, %328 in 1 : vector<2x32xf32>, vector<2x32xf32> -> vector<2x64xf32>
    %330 = vector.extract_strided_slice %323 {offsets = [0, 64], sizes = [2, 32], strides = [1, 1]} : vector<2x256xf32> to vector<2x32xf32>
    %331 = vector.extract_strided_slice %323 {offsets = [0, 192], sizes = [2, 32], strides = [1, 1]} : vector<2x256xf32> to vector<2x32xf32>
    %332 = tpu.concatenate %330, %331 in 1 : vector<2x32xf32>, vector<2x32xf32> -> vector<2x64xf32>
    %333 = vector.extract_strided_slice %323 {offsets = [0, 96], sizes = [2, 32], strides = [1, 1]} : vector<2x256xf32> to vector<2x32xf32>
    %334 = vector.extract_strided_slice %323 {offsets = [0, 224], sizes = [2, 32], strides = [1, 1]} : vector<2x256xf32> to vector<2x32xf32>
    %335 = tpu.concatenate %333, %334 in 1 : vector<2x32xf32>, vector<2x32xf32> -> vector<2x64xf32>
    %336 = arith.mulf %329, %311 : vector<2x64xf32>
    %337 = arith.mulf %326, %332 : vector<2x64xf32>
    %338 = arith.addf %336, %337 : vector<2x64xf32>
    %339 = math.tanh %338 : vector<2x64xf32>
    %340 = arith.mulf %335, %339 : vector<2x64xf32>
    %341 = vector.extract_strided_slice %340 {offsets = [0, 0], sizes = [2, 32], strides = [1, 1]} : vector<2x64xf32> to vector<2x32xf32>
    %342 = vector.extract_strided_slice %340 {offsets = [0, 32], sizes = [2, 32], strides = [1, 1]} : vector<2x64xf32> to vector<2x32xf32>
    %343 = vector.extract_strided_slice %309 {offsets = [2, 0], sizes = [2, 128], strides = [1, 1]} : vector<16x256xf32> to vector<2x128xf32>
    %344 = vector.extract_strided_slice %309 {offsets = [12, 128], sizes = [2, 128], strides = [1, 1]} : vector<16x256xf32> to vector<2x128xf32>
    %345 = tpu.concatenate %343, %344 in 1 : vector<2x128xf32>, vector<2x128xf32> -> vector<2x256xf32>
    %cst_45 = arith.constant dense<0.000000e+00> : vector<2x256xf32>
    %346 = tpu.matmul %340, %305, %cst_45 {dimension_numbers = #tpu.dot_dimension_numbers<[1], [0], [0], [1], [0, 0, 1, 1], [], []>} : vector<2x64xf32>, vector<64x256xf32>, vector<2x256xf32> -> vector<2x256xf32>
    %347 = arith.addf %345, %346 : vector<2x256xf32>
    %348 = math.tanh %347 : vector<2x256xf32>
    %349 = arith.negf %347 : vector<2x256xf32>
    %350 = math.exp %349 : vector<2x256xf32>
    %cst_46 = arith.constant 1.000000e+00 : f32
    %351 = vector.broadcast %cst_46 : f32 to vector<2x256xf32>
    %352 = arith.addf %351, %350 : vector<2x256xf32>
    %353 = arith.divf %351, %352 : vector<2x256xf32>
    %354 = arith.select %37, %348, %353 : vector<2x256xi1>, vector<2x256xf32>
    %355 = vector.extract_strided_slice %354 {offsets = [0, 0], sizes = [2, 32], strides = [1, 1]} : vector<2x256xf32> to vector<2x32xf32>
    %356 = vector.extract_strided_slice %354 {offsets = [0, 128], sizes = [2, 32], strides = [1, 1]} : vector<2x256xf32> to vector<2x32xf32>
    %357 = tpu.concatenate %355, %356 in 1 : vector<2x32xf32>, vector<2x32xf32> -> vector<2x64xf32>
    %358 = vector.extract_strided_slice %354 {offsets = [0, 32], sizes = [2, 32], strides = [1, 1]} : vector<2x256xf32> to vector<2x32xf32>
    %359 = vector.extract_strided_slice %354 {offsets = [0, 160], sizes = [2, 32], strides = [1, 1]} : vector<2x256xf32> to vector<2x32xf32>
    %360 = tpu.concatenate %358, %359 in 1 : vector<2x32xf32>, vector<2x32xf32> -> vector<2x64xf32>
    %361 = vector.extract_strided_slice %354 {offsets = [0, 64], sizes = [2, 32], strides = [1, 1]} : vector<2x256xf32> to vector<2x32xf32>
    %362 = vector.extract_strided_slice %354 {offsets = [0, 192], sizes = [2, 32], strides = [1, 1]} : vector<2x256xf32> to vector<2x32xf32>
    %363 = tpu.concatenate %361, %362 in 1 : vector<2x32xf32>, vector<2x32xf32> -> vector<2x64xf32>
    %364 = vector.extract_strided_slice %354 {offsets = [0, 96], sizes = [2, 32], strides = [1, 1]} : vector<2x256xf32> to vector<2x32xf32>
    %365 = vector.extract_strided_slice %354 {offsets = [0, 224], sizes = [2, 32], strides = [1, 1]} : vector<2x256xf32> to vector<2x32xf32>
    %366 = tpu.concatenate %364, %365 in 1 : vector<2x32xf32>, vector<2x32xf32> -> vector<2x64xf32>
    %367 = arith.mulf %360, %338 : vector<2x64xf32>
    %368 = arith.mulf %357, %363 : vector<2x64xf32>
    %369 = arith.addf %367, %368 : vector<2x64xf32>
    %370 = math.tanh %369 : vector<2x64xf32>
    %371 = arith.mulf %366, %370 : vector<2x64xf32>
    %372 = vector.extract_strided_slice %371 {offsets = [0, 0], sizes = [2, 32], strides = [1, 1]} : vector<2x64xf32> to vector<2x32xf32>
    %373 = vector.extract_strided_slice %371 {offsets = [0, 32], sizes = [2, 32], strides = [1, 1]} : vector<2x64xf32> to vector<2x32xf32>
    %374 = vector.extract_strided_slice %309 {offsets = [4, 0], sizes = [2, 128], strides = [1, 1]} : vector<16x256xf32> to vector<2x128xf32>
    %375 = vector.extract_strided_slice %309 {offsets = [10, 128], sizes = [2, 128], strides = [1, 1]} : vector<16x256xf32> to vector<2x128xf32>
    %376 = tpu.concatenate %374, %375 in 1 : vector<2x128xf32>, vector<2x128xf32> -> vector<2x256xf32>
    %cst_47 = arith.constant dense<0.000000e+00> : vector<2x256xf32>
    %377 = tpu.matmul %371, %305, %cst_47 {dimension_numbers = #tpu.dot_dimension_numbers<[1], [0], [0], [1], [0, 0, 1, 1], [], []>} : vector<2x64xf32>, vector<64x256xf32>, vector<2x256xf32> -> vector<2x256xf32>
    %378 = arith.addf %376, %377 : vector<2x256xf32>
    %379 = math.tanh %378 : vector<2x256xf32>
    %380 = arith.negf %378 : vector<2x256xf32>
    %381 = math.exp %380 : vector<2x256xf32>
    %cst_48 = arith.constant 1.000000e+00 : f32
    %382 = vector.broadcast %cst_48 : f32 to vector<2x256xf32>
    %383 = arith.addf %382, %381 : vector<2x256xf32>
    %384 = arith.divf %382, %383 : vector<2x256xf32>
    %385 = arith.select %37, %379, %384 : vector<2x256xi1>, vector<2x256xf32>
    %386 = vector.extract_strided_slice %385 {offsets = [0, 0], sizes = [2, 32], strides = [1, 1]} : vector<2x256xf32> to vector<2x32xf32>
    %387 = vector.extract_strided_slice %385 {offsets = [0, 128], sizes = [2, 32], strides = [1, 1]} : vector<2x256xf32> to vector<2x32xf32>
    %388 = tpu.concatenate %386, %387 in 1 : vector<2x32xf32>, vector<2x32xf32> -> vector<2x64xf32>
    %389 = vector.extract_strided_slice %385 {offsets = [0, 32], sizes = [2, 32], strides = [1, 1]} : vector<2x256xf32> to vector<2x32xf32>
    %390 = vector.extract_strided_slice %385 {offsets = [0, 160], sizes = [2, 32], strides = [1, 1]} : vector<2x256xf32> to vector<2x32xf32>
    %391 = tpu.concatenate %389, %390 in 1 : vector<2x32xf32>, vector<2x32xf32> -> vector<2x64xf32>
    %392 = vector.extract_strided_slice %385 {offsets = [0, 64], sizes = [2, 32], strides = [1, 1]} : vector<2x256xf32> to vector<2x32xf32>
    %393 = vector.extract_strided_slice %385 {offsets = [0, 192], sizes = [2, 32], strides = [1, 1]} : vector<2x256xf32> to vector<2x32xf32>
    %394 = tpu.concatenate %392, %393 in 1 : vector<2x32xf32>, vector<2x32xf32> -> vector<2x64xf32>
    %395 = vector.extract_strided_slice %385 {offsets = [0, 96], sizes = [2, 32], strides = [1, 1]} : vector<2x256xf32> to vector<2x32xf32>
    %396 = vector.extract_strided_slice %385 {offsets = [0, 224], sizes = [2, 32], strides = [1, 1]} : vector<2x256xf32> to vector<2x32xf32>
    %397 = tpu.concatenate %395, %396 in 1 : vector<2x32xf32>, vector<2x32xf32> -> vector<2x64xf32>
    %398 = arith.mulf %391, %369 : vector<2x64xf32>
    %399 = arith.mulf %388, %394 : vector<2x64xf32>
    %400 = arith.addf %398, %399 : vector<2x64xf32>
    %401 = math.tanh %400 : vector<2x64xf32>
    %402 = arith.mulf %397, %401 : vector<2x64xf32>
    %403 = vector.extract_strided_slice %402 {offsets = [0, 0], sizes = [2, 32], strides = [1, 1]} : vector<2x64xf32> to vector<2x32xf32>
    %404 = vector.extract_strided_slice %402 {offsets = [0, 32], sizes = [2, 32], strides = [1, 1]} : vector<2x64xf32> to vector<2x32xf32>
    %405 = vector.extract_strided_slice %309 {offsets = [6, 0], sizes = [2, 128], strides = [1, 1]} : vector<16x256xf32> to vector<2x128xf32>
    %406 = vector.extract_strided_slice %309 {offsets = [8, 128], sizes = [2, 128], strides = [1, 1]} : vector<16x256xf32> to vector<2x128xf32>
    %407 = tpu.concatenate %405, %406 in 1 : vector<2x128xf32>, vector<2x128xf32> -> vector<2x256xf32>
    %cst_49 = arith.constant dense<0.000000e+00> : vector<2x256xf32>
    %408 = tpu.matmul %402, %305, %cst_49 {dimension_numbers = #tpu.dot_dimension_numbers<[1], [0], [0], [1], [0, 0, 1, 1], [], []>} : vector<2x64xf32>, vector<64x256xf32>, vector<2x256xf32> -> vector<2x256xf32>
    %409 = arith.addf %407, %408 : vector<2x256xf32>
    %410 = math.tanh %409 : vector<2x256xf32>
    %411 = arith.negf %409 : vector<2x256xf32>
    %412 = math.exp %411 : vector<2x256xf32>
    %cst_50 = arith.constant 1.000000e+00 : f32
    %413 = vector.broadcast %cst_50 : f32 to vector<2x256xf32>
    %414 = arith.addf %413, %412 : vector<2x256xf32>
    %415 = arith.divf %413, %414 : vector<2x256xf32>
    %416 = arith.select %37, %410, %415 : vector<2x256xi1>, vector<2x256xf32>
    %417 = vector.extract_strided_slice %416 {offsets = [0, 0], sizes = [2, 32], strides = [1, 1]} : vector<2x256xf32> to vector<2x32xf32>
    %418 = vector.extract_strided_slice %416 {offsets = [0, 128], sizes = [2, 32], strides = [1, 1]} : vector<2x256xf32> to vector<2x32xf32>
    %419 = tpu.concatenate %417, %418 in 1 : vector<2x32xf32>, vector<2x32xf32> -> vector<2x64xf32>
    %420 = vector.extract_strided_slice %416 {offsets = [0, 32], sizes = [2, 32], strides = [1, 1]} : vector<2x256xf32> to vector<2x32xf32>
    %421 = vector.extract_strided_slice %416 {offsets = [0, 160], sizes = [2, 32], strides = [1, 1]} : vector<2x256xf32> to vector<2x32xf32>
    %422 = tpu.concatenate %420, %421 in 1 : vector<2x32xf32>, vector<2x32xf32> -> vector<2x64xf32>
    %423 = vector.extract_strided_slice %416 {offsets = [0, 64], sizes = [2, 32], strides = [1, 1]} : vector<2x256xf32> to vector<2x32xf32>
    %424 = vector.extract_strided_slice %416 {offsets = [0, 192], sizes = [2, 32], strides = [1, 1]} : vector<2x256xf32> to vector<2x32xf32>
    %425 = tpu.concatenate %423, %424 in 1 : vector<2x32xf32>, vector<2x32xf32> -> vector<2x64xf32>
    %426 = vector.extract_strided_slice %416 {offsets = [0, 96], sizes = [2, 32], strides = [1, 1]} : vector<2x256xf32> to vector<2x32xf32>
    %427 = vector.extract_strided_slice %416 {offsets = [0, 224], sizes = [2, 32], strides = [1, 1]} : vector<2x256xf32> to vector<2x32xf32>
    %428 = tpu.concatenate %426, %427 in 1 : vector<2x32xf32>, vector<2x32xf32> -> vector<2x64xf32>
    %429 = arith.mulf %422, %400 : vector<2x64xf32>
    %430 = arith.mulf %419, %425 : vector<2x64xf32>
    %431 = arith.addf %429, %430 : vector<2x64xf32>
    %432 = math.tanh %431 : vector<2x64xf32>
    %433 = arith.mulf %428, %432 : vector<2x64xf32>
    %434 = vector.extract_strided_slice %433 {offsets = [0, 0], sizes = [2, 32], strides = [1, 1]} : vector<2x64xf32> to vector<2x32xf32>
    %435 = vector.extract_strided_slice %433 {offsets = [0, 32], sizes = [2, 32], strides = [1, 1]} : vector<2x64xf32> to vector<2x32xf32>
    %436 = vector.extract_strided_slice %309 {offsets = [8, 0], sizes = [2, 128], strides = [1, 1]} : vector<16x256xf32> to vector<2x128xf32>
    %437 = vector.extract_strided_slice %309 {offsets = [6, 128], sizes = [2, 128], strides = [1, 1]} : vector<16x256xf32> to vector<2x128xf32>
    %438 = tpu.concatenate %436, %437 in 1 : vector<2x128xf32>, vector<2x128xf32> -> vector<2x256xf32>
    %cst_51 = arith.constant dense<0.000000e+00> : vector<2x256xf32>
    %439 = tpu.matmul %433, %305, %cst_51 {dimension_numbers = #tpu.dot_dimension_numbers<[1], [0], [0], [1], [0, 0, 1, 1], [], []>} : vector<2x64xf32>, vector<64x256xf32>, vector<2x256xf32> -> vector<2x256xf32>
    %440 = arith.addf %438, %439 : vector<2x256xf32>
    %441 = math.tanh %440 : vector<2x256xf32>
    %442 = arith.negf %440 : vector<2x256xf32>
    %443 = math.exp %442 : vector<2x256xf32>
    %cst_52 = arith.constant 1.000000e+00 : f32
    %444 = vector.broadcast %cst_52 : f32 to vector<2x256xf32>
    %445 = arith.addf %444, %443 : vector<2x256xf32>
    %446 = arith.divf %444, %445 : vector<2x256xf32>
    %447 = arith.select %37, %441, %446 : vector<2x256xi1>, vector<2x256xf32>
    %448 = vector.extract_strided_slice %447 {offsets = [0, 0], sizes = [2, 32], strides = [1, 1]} : vector<2x256xf32> to vector<2x32xf32>
    %449 = vector.extract_strided_slice %447 {offsets = [0, 128], sizes = [2, 32], strides = [1, 1]} : vector<2x256xf32> to vector<2x32xf32>
    %450 = tpu.concatenate %448, %449 in 1 : vector<2x32xf32>, vector<2x32xf32> -> vector<2x64xf32>
    %451 = vector.extract_strided_slice %447 {offsets = [0, 32], sizes = [2, 32], strides = [1, 1]} : vector<2x256xf32> to vector<2x32xf32>
    %452 = vector.extract_strided_slice %447 {offsets = [0, 160], sizes = [2, 32], strides = [1, 1]} : vector<2x256xf32> to vector<2x32xf32>
    %453 = tpu.concatenate %451, %452 in 1 : vector<2x32xf32>, vector<2x32xf32> -> vector<2x64xf32>
    %454 = vector.extract_strided_slice %447 {offsets = [0, 64], sizes = [2, 32], strides = [1, 1]} : vector<2x256xf32> to vector<2x32xf32>
    %455 = vector.extract_strided_slice %447 {offsets = [0, 192], sizes = [2, 32], strides = [1, 1]} : vector<2x256xf32> to vector<2x32xf32>
    %456 = tpu.concatenate %454, %455 in 1 : vector<2x32xf32>, vector<2x32xf32> -> vector<2x64xf32>
    %457 = vector.extract_strided_slice %447 {offsets = [0, 96], sizes = [2, 32], strides = [1, 1]} : vector<2x256xf32> to vector<2x32xf32>
    %458 = vector.extract_strided_slice %447 {offsets = [0, 224], sizes = [2, 32], strides = [1, 1]} : vector<2x256xf32> to vector<2x32xf32>
    %459 = tpu.concatenate %457, %458 in 1 : vector<2x32xf32>, vector<2x32xf32> -> vector<2x64xf32>
    %460 = arith.mulf %453, %431 : vector<2x64xf32>
    %461 = arith.mulf %450, %456 : vector<2x64xf32>
    %462 = arith.addf %460, %461 : vector<2x64xf32>
    %463 = math.tanh %462 : vector<2x64xf32>
    %464 = arith.mulf %459, %463 : vector<2x64xf32>
    %465 = vector.extract_strided_slice %464 {offsets = [0, 0], sizes = [2, 32], strides = [1, 1]} : vector<2x64xf32> to vector<2x32xf32>
    %466 = vector.extract_strided_slice %464 {offsets = [0, 32], sizes = [2, 32], strides = [1, 1]} : vector<2x64xf32> to vector<2x32xf32>
    %467 = vector.extract_strided_slice %309 {offsets = [10, 0], sizes = [2, 128], strides = [1, 1]} : vector<16x256xf32> to vector<2x128xf32>
    %468 = vector.extract_strided_slice %309 {offsets = [4, 128], sizes = [2, 128], strides = [1, 1]} : vector<16x256xf32> to vector<2x128xf32>
    %469 = tpu.concatenate %467, %468 in 1 : vector<2x128xf32>, vector<2x128xf32> -> vector<2x256xf32>
    %cst_53 = arith.constant dense<0.000000e+00> : vector<2x256xf32>
    %470 = tpu.matmul %464, %305, %cst_53 {dimension_numbers = #tpu.dot_dimension_numbers<[1], [0], [0], [1], [0, 0, 1, 1], [], []>} : vector<2x64xf32>, vector<64x256xf32>, vector<2x256xf32> -> vector<2x256xf32>
    %471 = arith.addf %469, %470 : vector<2x256xf32>
    %472 = math.tanh %471 : vector<2x256xf32>
    %473 = arith.negf %471 : vector<2x256xf32>
    %474 = math.exp %473 : vector<2x256xf32>
    %cst_54 = arith.constant 1.000000e+00 : f32
    %475 = vector.broadcast %cst_54 : f32 to vector<2x256xf32>
    %476 = arith.addf %475, %474 : vector<2x256xf32>
    %477 = arith.divf %475, %476 : vector<2x256xf32>
    %478 = arith.select %37, %472, %477 : vector<2x256xi1>, vector<2x256xf32>
    %479 = vector.extract_strided_slice %478 {offsets = [0, 0], sizes = [2, 32], strides = [1, 1]} : vector<2x256xf32> to vector<2x32xf32>
    %480 = vector.extract_strided_slice %478 {offsets = [0, 128], sizes = [2, 32], strides = [1, 1]} : vector<2x256xf32> to vector<2x32xf32>
    %481 = tpu.concatenate %479, %480 in 1 : vector<2x32xf32>, vector<2x32xf32> -> vector<2x64xf32>
    %482 = vector.extract_strided_slice %478 {offsets = [0, 32], sizes = [2, 32], strides = [1, 1]} : vector<2x256xf32> to vector<2x32xf32>
    %483 = vector.extract_strided_slice %478 {offsets = [0, 160], sizes = [2, 32], strides = [1, 1]} : vector<2x256xf32> to vector<2x32xf32>
    %484 = tpu.concatenate %482, %483 in 1 : vector<2x32xf32>, vector<2x32xf32> -> vector<2x64xf32>
    %485 = vector.extract_strided_slice %478 {offsets = [0, 64], sizes = [2, 32], strides = [1, 1]} : vector<2x256xf32> to vector<2x32xf32>
    %486 = vector.extract_strided_slice %478 {offsets = [0, 192], sizes = [2, 32], strides = [1, 1]} : vector<2x256xf32> to vector<2x32xf32>
    %487 = tpu.concatenate %485, %486 in 1 : vector<2x32xf32>, vector<2x32xf32> -> vector<2x64xf32>
    %488 = vector.extract_strided_slice %478 {offsets = [0, 96], sizes = [2, 32], strides = [1, 1]} : vector<2x256xf32> to vector<2x32xf32>
    %489 = vector.extract_strided_slice %478 {offsets = [0, 224], sizes = [2, 32], strides = [1, 1]} : vector<2x256xf32> to vector<2x32xf32>
    %490 = tpu.concatenate %488, %489 in 1 : vector<2x32xf32>, vector<2x32xf32> -> vector<2x64xf32>
    %491 = arith.mulf %484, %462 : vector<2x64xf32>
    %492 = arith.mulf %481, %487 : vector<2x64xf32>
    %493 = arith.addf %491, %492 : vector<2x64xf32>
    %494 = math.tanh %493 : vector<2x64xf32>
    %495 = arith.mulf %490, %494 : vector<2x64xf32>
    %496 = vector.extract_strided_slice %495 {offsets = [0, 0], sizes = [2, 32], strides = [1, 1]} : vector<2x64xf32> to vector<2x32xf32>
    %497 = vector.extract_strided_slice %495 {offsets = [0, 32], sizes = [2, 32], strides = [1, 1]} : vector<2x64xf32> to vector<2x32xf32>
    %498 = vector.extract_strided_slice %309 {offsets = [12, 0], sizes = [2, 128], strides = [1, 1]} : vector<16x256xf32> to vector<2x128xf32>
    %499 = vector.extract_strided_slice %309 {offsets = [2, 128], sizes = [2, 128], strides = [1, 1]} : vector<16x256xf32> to vector<2x128xf32>
    %500 = tpu.concatenate %498, %499 in 1 : vector<2x128xf32>, vector<2x128xf32> -> vector<2x256xf32>
    %cst_55 = arith.constant dense<0.000000e+00> : vector<2x256xf32>
    %501 = tpu.matmul %495, %305, %cst_55 {dimension_numbers = #tpu.dot_dimension_numbers<[1], [0], [0], [1], [0, 0, 1, 1], [], []>} : vector<2x64xf32>, vector<64x256xf32>, vector<2x256xf32> -> vector<2x256xf32>
    %502 = arith.addf %500, %501 : vector<2x256xf32>
    %503 = math.tanh %502 : vector<2x256xf32>
    %504 = arith.negf %502 : vector<2x256xf32>
    %505 = math.exp %504 : vector<2x256xf32>
    %cst_56 = arith.constant 1.000000e+00 : f32
    %506 = vector.broadcast %cst_56 : f32 to vector<2x256xf32>
    %507 = arith.addf %506, %505 : vector<2x256xf32>
    %508 = arith.divf %506, %507 : vector<2x256xf32>
    %509 = arith.select %37, %503, %508 : vector<2x256xi1>, vector<2x256xf32>
    %510 = vector.extract_strided_slice %509 {offsets = [0, 0], sizes = [2, 32], strides = [1, 1]} : vector<2x256xf32> to vector<2x32xf32>
    %511 = vector.extract_strided_slice %509 {offsets = [0, 128], sizes = [2, 32], strides = [1, 1]} : vector<2x256xf32> to vector<2x32xf32>
    %512 = tpu.concatenate %510, %511 in 1 : vector<2x32xf32>, vector<2x32xf32> -> vector<2x64xf32>
    %513 = vector.extract_strided_slice %509 {offsets = [0, 32], sizes = [2, 32], strides = [1, 1]} : vector<2x256xf32> to vector<2x32xf32>
    %514 = vector.extract_strided_slice %509 {offsets = [0, 160], sizes = [2, 32], strides = [1, 1]} : vector<2x256xf32> to vector<2x32xf32>
    %515 = tpu.concatenate %513, %514 in 1 : vector<2x32xf32>, vector<2x32xf32> -> vector<2x64xf32>
    %516 = vector.extract_strided_slice %509 {offsets = [0, 64], sizes = [2, 32], strides = [1, 1]} : vector<2x256xf32> to vector<2x32xf32>
    %517 = vector.extract_strided_slice %509 {offsets = [0, 192], sizes = [2, 32], strides = [1, 1]} : vector<2x256xf32> to vector<2x32xf32>
    %518 = tpu.concatenate %516, %517 in 1 : vector<2x32xf32>, vector<2x32xf32> -> vector<2x64xf32>
    %519 = vector.extract_strided_slice %509 {offsets = [0, 96], sizes = [2, 32], strides = [1, 1]} : vector<2x256xf32> to vector<2x32xf32>
    %520 = vector.extract_strided_slice %509 {offsets = [0, 224], sizes = [2, 32], strides = [1, 1]} : vector<2x256xf32> to vector<2x32xf32>
    %521 = tpu.concatenate %519, %520 in 1 : vector<2x32xf32>, vector<2x32xf32> -> vector<2x64xf32>
    %522 = arith.mulf %515, %493 : vector<2x64xf32>
    %523 = arith.mulf %512, %518 : vector<2x64xf32>
    %524 = arith.addf %522, %523 : vector<2x64xf32>
    %525 = math.tanh %524 : vector<2x64xf32>
    %526 = arith.mulf %521, %525 : vector<2x64xf32>
    %527 = vector.extract_strided_slice %526 {offsets = [0, 0], sizes = [2, 32], strides = [1, 1]} : vector<2x64xf32> to vector<2x32xf32>
    %528 = vector.extract_strided_slice %526 {offsets = [0, 32], sizes = [2, 32], strides = [1, 1]} : vector<2x64xf32> to vector<2x32xf32>
    %529 = vector.extract_strided_slice %309 {offsets = [14, 0], sizes = [2, 128], strides = [1, 1]} : vector<16x256xf32> to vector<2x128xf32>
    %530 = vector.extract_strided_slice %309 {offsets = [0, 128], sizes = [2, 128], strides = [1, 1]} : vector<16x256xf32> to vector<2x128xf32>
    %531 = tpu.concatenate %529, %530 in 1 : vector<2x128xf32>, vector<2x128xf32> -> vector<2x256xf32>
    %cst_57 = arith.constant dense<0.000000e+00> : vector<2x256xf32>
    %532 = tpu.matmul %526, %305, %cst_57 {dimension_numbers = #tpu.dot_dimension_numbers<[1], [0], [0], [1], [0, 0, 1, 1], [], []>} : vector<2x64xf32>, vector<64x256xf32>, vector<2x256xf32> -> vector<2x256xf32>
    %533 = arith.addf %531, %532 : vector<2x256xf32>
    %534 = math.tanh %533 : vector<2x256xf32>
    %535 = arith.negf %533 : vector<2x256xf32>
    %536 = math.exp %535 : vector<2x256xf32>
    %cst_58 = arith.constant 1.000000e+00 : f32
    %537 = vector.broadcast %cst_58 : f32 to vector<2x256xf32>
    %538 = arith.addf %537, %536 : vector<2x256xf32>
    %539 = arith.divf %537, %538 : vector<2x256xf32>
    %540 = arith.select %37, %534, %539 : vector<2x256xi1>, vector<2x256xf32>
    %541 = vector.extract_strided_slice %540 {offsets = [0, 0], sizes = [2, 32], strides = [1, 1]} : vector<2x256xf32> to vector<2x32xf32>
    %542 = vector.extract_strided_slice %540 {offsets = [0, 128], sizes = [2, 32], strides = [1, 1]} : vector<2x256xf32> to vector<2x32xf32>
    %543 = tpu.concatenate %541, %542 in 1 : vector<2x32xf32>, vector<2x32xf32> -> vector<2x64xf32>
    %544 = vector.extract_strided_slice %540 {offsets = [0, 32], sizes = [2, 32], strides = [1, 1]} : vector<2x256xf32> to vector<2x32xf32>
    %545 = vector.extract_strided_slice %540 {offsets = [0, 160], sizes = [2, 32], strides = [1, 1]} : vector<2x256xf32> to vector<2x32xf32>
    %546 = tpu.concatenate %544, %545 in 1 : vector<2x32xf32>, vector<2x32xf32> -> vector<2x64xf32>
    %547 = vector.extract_strided_slice %540 {offsets = [0, 64], sizes = [2, 32], strides = [1, 1]} : vector<2x256xf32> to vector<2x32xf32>
    %548 = vector.extract_strided_slice %540 {offsets = [0, 192], sizes = [2, 32], strides = [1, 1]} : vector<2x256xf32> to vector<2x32xf32>
    %549 = tpu.concatenate %547, %548 in 1 : vector<2x32xf32>, vector<2x32xf32> -> vector<2x64xf32>
    %550 = vector.extract_strided_slice %540 {offsets = [0, 96], sizes = [2, 32], strides = [1, 1]} : vector<2x256xf32> to vector<2x32xf32>
    %551 = vector.extract_strided_slice %540 {offsets = [0, 224], sizes = [2, 32], strides = [1, 1]} : vector<2x256xf32> to vector<2x32xf32>
    %552 = tpu.concatenate %550, %551 in 1 : vector<2x32xf32>, vector<2x32xf32> -> vector<2x64xf32>
    %553 = arith.mulf %546, %524 : vector<2x64xf32>
    %554 = arith.mulf %543, %549 : vector<2x64xf32>
    %555 = arith.addf %553, %554 : vector<2x64xf32>
    %556 = math.tanh %555 : vector<2x64xf32>
    %557 = arith.mulf %552, %556 : vector<2x64xf32>
    %558 = vector.extract_strided_slice %557 {offsets = [0, 0], sizes = [2, 32], strides = [1, 1]} : vector<2x64xf32> to vector<2x32xf32>
    %559 = vector.extract_strided_slice %557 {offsets = [0, 32], sizes = [2, 32], strides = [1, 1]} : vector<2x64xf32> to vector<2x32xf32>
    %560 = tpu.concatenate %341, %559 in 1 : vector<2x32xf32>, vector<2x32xf32> -> vector<2x64xf32>
    %561 = tpu.concatenate %372, %528 in 1 : vector<2x32xf32>, vector<2x32xf32> -> vector<2x64xf32>
    %562 = tpu.concatenate %403, %497 in 1 : vector<2x32xf32>, vector<2x32xf32> -> vector<2x64xf32>
    %563 = tpu.concatenate %434, %466 in 1 : vector<2x32xf32>, vector<2x32xf32> -> vector<2x64xf32>
    %564 = tpu.concatenate %465, %435 in 1 : vector<2x32xf32>, vector<2x32xf32> -> vector<2x64xf32>
    %565 = tpu.concatenate %496, %404 in 1 : vector<2x32xf32>, vector<2x32xf32> -> vector<2x64xf32>
    %566 = tpu.concatenate %527, %373 in 1 : vector<2x32xf32>, vector<2x32xf32> -> vector<2x64xf32>
    %567 = tpu.concatenate %558, %342 in 1 : vector<2x32xf32>, vector<2x32xf32> -> vector<2x64xf32>
    %568 = tpu.concatenate %560, %561, %562, %563, %564, %565, %566, %567 in 0 : vector<2x64xf32>, vector<2x64xf32>, vector<2x64xf32>, vector<2x64xf32>, vector<2x64xf32>, vector<2x64xf32>, vector<2x64xf32>, vector<2x64xf32> -> vector<16x64xf32>
    %c0_59 = arith.constant 0 : index
    %c0_60 = arith.constant 0 : index
    %569 = vector.load %arg7[%c0_59, %c0_60] : memref<1x64xf32, #tpu.memory_space<vmem>>, vector<1x64xf32>
    %570 = vector.broadcast %569 : vector<1x64xf32> to vector<16x64xf32>
    %571 = arith.mulf %568, %570 : vector<16x64xf32>
    %cst_61 = arith.constant dense<0.000000e+00> : vector<16xf32>
    %572 = vector.multi_reduction <add>, %571, %cst_61 [1] : vector<16x64xf32> to vector<16xf32>
    %573 = vector.shape_cast %572 : vector<16xf32> to vector<16x1xf32>
    %c0_62 = arith.constant 0 : index
    %c0_63 = arith.constant 0 : index
    %574 = vector.load %arg8[%c0_62, %c0_63] : memref<1x1xf32, #tpu.memory_space<vmem>>, vector<1x1xf32>
    %575 = vector.broadcast %574 : vector<1x1xf32> to vector<16x1xf32>
    %576 = arith.addf %573, %575 : vector<16x1xf32>
    %c0_64 = arith.constant 0 : index
    %c0_65 = arith.constant 0 : index
    %577 = vector.load %arg9[%c0_64, %c0_65] : memref<16x1xf32, #tpu.memory_space<vmem>>, vector<16x1xf32>
    tpu.vector_store %arg9[%c0_64, %c0_65], %576 {strides = array<i32>} : memref<16x1xf32, #tpu.memory_space<vmem>>, vector<16x1xf32>,
    return
  }
}

</mosaic_0001>

<bundles_post_ra>
// kernel: lstm_ff_forward.1
= control target key start
LH: loop header
LB: loop body
LE: loop exit
PB: predicated region body
PF: predicated region fallthrough
CT: control target
= control target key end

     0   :  { %s3947_s0 = inlined_call_operand.vmem [shape: f32[16,16], index: 0, kind: input, shape index: {}]   ;;  %s3948_s1 = inlined_call_operand.vmem [shape: f32[16,256], index: 1, kind: input, shape index: {}]   ;;  %s3949_s2 = inlined_call_operand.hbm [shape: f32[64,256], index: 2, kind: input, shape index: {}]   ;;  %s3950_s3 = inlined_call_operand.vmem [shape: f32[1,256], index: 3, kind: input, shape index: {}]   ;;  %s3951_s4 = inlined_call_operand.hbm [shape: f32[64,256], index: 4, kind: input, shape index: {}]   ;;  %s3952_s5 = inlined_call_operand.hbm [shape: f32[64,256], index: 5, kind: input, shape index: {}]   ;;  %s3953_s6 = inlined_call_operand.vmem [shape: f32[1,256], index: 6, kind: input, shape index: {}]   ;;  %s3954_s7 = inlined_call_operand.vmem [shape: f32[1,64], index: 7, kind: input, shape index: {}]   ;;  %s3955_s8 = inlined_call_operand.<no memory space> [shape: f32[1,1], index: 8, kind: input, shape index: {}]   ;;  %s3956_s9 = inlined_call_operand.vmem [shape: f32[16,1], index: 9, kind: output, shape index: {}]  }
   0x1   :  { %v14_v0 = vstv %s3955_s8 }
   0x2   :  { %15 = vst [vmem:[#allocation2] sm:$0x1] %v14_v0 }
   0x3   :  { %16 = vsyncpa [#allocation4], 0 }
   0x4   :  { %17 = vsyncpa [#allocation6], 0  ;;  %s3159_s11 = smov [#allocation5]   ;;  %s3160_s13 = smov [#allocation3]  }
   0x5   :  { %s41_s12 = sshll.u32 %s3159_s11, 4  ;;  %s27_s14 = sshll.u32 %s3160_s13, 4  ;;  %s42_s12 = int_to_ptr.vmem [resolvable:$true] %s41_s12  ;;  %s3221_s14 = int_to_ptr.vmem [resolvable:$true] %s27_s14 }
   0x6   :  { %s3089_s17 = scalar_lea.hbm %s3951_s4, 2048 }
   0x7   :  { %p3090_p0 = scmp.ne.s32.totalorder %s3951_s4, %s3089_s17  ;;  %p3093_p1 = scmp.lt.u32.totalorder %s3089_s17, %s3951_s4 }
   0x9   :  { %p3095_p2 = pnand %p3093_p1, %p3090_p0 }
   0xb   :  { %3098 = shalt.err (!%p3095_p2)
}
   0xc   :  { %s3099_s21 = scalar_lea.vmem %s42_s12, 2048  ;;  %p3104_p4 = scmp.lt.s32.totalorder %s42_s12, %s42_s12 }
   0xd   :  { %p3100_p3 = scmp.ne.s32.totalorder %s42_s12, %s3099_s21  ;;  %p3105_p5 = scmp.lt.s32.totalorder %s3099_s21, %s3099_s21 }
   0xf   :  { %p3106_p6 = por %p3105_p5, %p3104_p4 }
  0x11   :  { %p3107_p7 = pnand %p3106_p6, %p3100_p3 }
  0x13   :  { %3110 = shalt.err (!%p3107_p7)
}
  0x14   :  { %s3161_s22 = smov 256   ;;  %s3162_s23 = smov 16  }
  0x15   :  { %47 = dma.hbm_to_vmem [thread:$0]  %s3951_s4, 2048, %s42_s12, [#allocation6], %s3161_s22, %s3161_s22, %s3162_s23  }
  0x16   :  { %s3111_s28 = scalar_lea.hbm %s3949_s2, 2048 }
  0x17   :  { %p3112_p8 = scmp.ne.s32.totalorder %s3949_s2, %s3111_s28  ;;  %p3115_p9 = scmp.lt.u32.totalorder %s3111_s28, %s3949_s2 }
  0x19   :  { %p3117_p10 = pnand %p3115_p9, %p3112_p8 }
  0x1b   :  { %3120 = shalt.err (!%p3117_p10)
}
  0x1c   :  { %s3121_s13 = scalar_lea.vmem %s3221_s14, 2048  ;;  %p3126_p12 = scmp.lt.s32.totalorder %s3221_s14, %s3221_s14 }
  0x1d   :  { %p3122_p11 = scmp.ne.s32.totalorder %s3221_s14, %s3121_s13  ;;  %p3127_p13 = scmp.lt.s32.totalorder %s3121_s13, %s3121_s13 }
  0x1f   :  { %p3128_p0 = por %p3127_p13, %p3126_p12 }
  0x21   :  { %p3129_p1 = pnand %p3128_p0, %p3122_p11 }
  0x23   :  { %3132 = shalt.err (!%p3129_p1)
}
  0x24   :  { %33 = dma.hbm_to_vmem [thread:$0]  %s3949_s2, 2048, %s3221_s14, [#allocation4], %s3161_s22, %s3161_s22, %s3162_s23  }
  0x25   :  { %s3163_s15 = smov [#allocation7]   ;;  %s3133_s19 = scalar_lea.hbm %s3952_s5, 2048 }
  0x26   :  { %s53_s16 = sshll.u32 %s3163_s15, 4  ;;  %p3134_p2 = scmp.ne.s32.totalorder %s3952_s5, %s3133_s19  ;;  %s54_s16 = int_to_ptr.vmem [resolvable:$true] %s53_s16 }
  0x27   :  { %p3137_p3 = scmp.lt.u32.totalorder %s3133_s19, %s3952_s5 }
  0x29   :  { %p3139_p4 = pnand %p3137_p3, %p3134_p2 }
  0x2b   :  { %3142 = shalt.err (!%p3139_p4)
}
  0x2c   :  { %s3143_s25 = scalar_lea.vmem %s54_s16, 2048  ;;  %p3148_p6 = scmp.lt.s32.totalorder %s54_s16, %s54_s16 }
  0x2d   :  { %p3144_p5 = scmp.ne.s32.totalorder %s54_s16, %s3143_s25  ;;  %p3149_p7 = scmp.lt.s32.totalorder %s3143_s25, %s3143_s25 }
  0x2f   :  { %p3150_p8 = por %p3149_p7, %p3148_p6 }
  0x31   :  { %p3151_p9 = pnand %p3150_p8, %p3144_p5 }
  0x33   :  { %3154 = shalt.err (!%p3151_p9)
}
  0x34   :  { %59 = dma.hbm_to_vmem [thread:$0]  %s3952_s5, 2048, %s54_s16, [#allocation6], %s3161_s22, %s3161_s22, %s3162_s23  }
  0x35   :  { %3155 = dma.done.wait [#allocation4], 2048  }
  0x36   :  { %3156 = vsyncadd [#allocation4], 4294965248 }
  0x37   :  { %3157 = dma.done.wait [#allocation6], 4096  }
  0x38   :  { %3158 = vsyncadd [#allocation6], 4294963200  ;;  %v3164_v1 = vmov 0.0   ;;  %v115_v2 = vld [vmem:[#allocation3 + $0x8] sm:$0xff]  ;;  %v117_v3 = vld [vmem:[#allocation3 + $0x18] sm:$0xff]  ;;  %vm142_vm0 = vcmask 130048   ;;  %v75_v34 = vlaneseq }
  0x39   :  { %213 = vmatprep.mubr.f32.mxu0 %v3164_v1  ;;  %297 = vmatprep.mubr.f32.mxu1 %v3164_v1  ;;  %v114_v4 = vld [vmem:[#allocation3] sm:$0xff]  ;;  %v3275_v5 = vpack.c.bf16 %v117_v3, %v115_v2  ;;  %v116_v6 = vld [vmem:[#allocation3 + $0x10] sm:$0xff]  ;;  %v119_v13 = vld [vmem:[#allocation3 + $0x28] sm:$0xff]  ;;  %s3166_s12 = smov 32   ;;  %s3167_s15 = smov 96   ;;  %vm326_vm7 = vcmask 261120  }
  0x3a   :  { %v111_v7 = vld [vmem:[%s3948_s1 + $0x8] sm:$0xff]  ;;  %v113_v8 = vld [vmem:[%s3948_s1 + $0x18] sm:$0xff]  ;;  %v3283_v9 = vpack.c.bf16 %v116_v6, %v114_v4  ;;  %v110_v11 = vld [vmem:[%s3948_s1] sm:$0xff]  ;;  %v3341_v35 = vshrl.u32 %v75_v34, 7  ;;  %v76_v56 = vand.u32 127, %v75_v34  ;;  %vm229_vm8 = vcmask 523264  }
  0x3b   :  { %v2580_v10 = vpack.c.bf16 %v113_v8, %v111_v7  ;;  %v112_v12 = vld [vmem:[%s3948_s1 + $0x10] sm:$0xff]  ;;  %2585 = vmatprep.subr.bf16.mxu1 %v3275_v5  ;;  %v121_v15 = vld [vmem:[#allocation3 + $0x38] sm:$0xff]  ;;  %v118_v16 = vld [vmem:[#allocation3 + $0x20] sm:$0xff]  ;;  %vm1292_vm9 = vcmask 1041408   ;;  %vm1294_vm10 = vcmask 1043456   ;;  %vm1296_vm11 = vcmask 1045504  }
  0x3c   :  { %v2582_v14 = vpack.c.bf16 %v112_v12, %v110_v11  ;;  %v120_v17 = vld [vmem:[#allocation3 + $0x30] sm:$0xff]  ;;  %2587 = vmatpush1.bf16.msra.mxu1 %v3283_v9  ;;  %v3293_v18 = vpack.c.bf16 %v121_v15, %v119_v13  ;;  %v123_v20 = vld [vmem:[#allocation3 + $0x48] sm:$0xff]  ;;  %v125_v21 = vld [vmem:[#allocation3 + $0x58] sm:$0xff]  ;;  %v138_v36 = vsub.s32 1, %v3341_v35  ;;  %v134_v39 = vsub.s32 0, %v3341_v35 }
  0x3d   :  { %2581 = vmatprep.subr.bf16.mxu0 %v2580_v10  ;;  %v3295_v19 = vpack.c.bf16 %v120_v17, %v118_v16  ;;  %v108_v22 = vld [vmem:[%s3947_s0] sm:$0xff]  ;;  %v3300_v23 = vpack.c.bf16 %v125_v21, %v123_v20  ;;  %v124_v25 = vld [vmem:[#allocation3 + $0x50] sm:$0xff]  ;;  %v127_v26 = vld [vmem:[#allocation3 + $0x68] sm:$0xff]  ;;  %v77_v59 = vadd.s32 128, %v76_v56  ;;  %vm102_vm1 = vcmp.ge.s32.totalorder %v76_v56, 64 }
  0x3e   :  { %2583 = vmatpush1.bf16.msra.mxu0 %v2582_v14  ;;  %v122_v24 = vld [vmem:[#allocation3 + $0x40] sm:$0xff]  ;;  %2589 = vmatprep.subr.bf16.mxu1 %v3293_v18  ;;  %v129_v27 = vld [vmem:[#allocation3 + $0x78] sm:$0xff]  ;;  %v128_v32 = vld [vmem:[#allocation3 + $0x70] sm:$0xff]  ;;  %vm104_vm2 = vcmp.lt.s32.totalorder %v76_v56, 96  ;;  %vm2519_vm12 = vcmask 7168  }
  0x3f   :  { %2601 = vmatprep.subr.bf16.mxu0 %v3275_v5  ;;  %v3306_v28 = vpack.c.bf16 %v124_v25, %v122_v24  ;;  %v109_v29 = vld [vmem:[%s3947_s0 + $0x8] sm:$0xff]  ;;  %v3313_v30 = vpack.c.bf16 %v129_v27, %v127_v26  ;;  %v130_v37 = vld [vmem:[%s3950_s3] sm:$0x3]  ;;  %v89_v62 = vand.u32 127, %v77_v59  ;;  %vm3364_vm5 = vmand %vm102_vm1, %vm104_vm2  ;;  %s3165_s3 = smov 64  }
  0x40   :  { %2591 = vmatpush1.bf16.msra.mxu1 %v3295_v19  ;;  %v126_v31 = vld [vmem:[#allocation3 + $0x60] sm:$0xff]  ;;  %v139_v38 = vrot.slane %v130_v37, %v138_v36  ;;  %v135_v43 = vrot.slane %v130_v37, %v134_v39 }
  0x41   :  { %2528 = vmatmul.mubr.msk.f32.vlgmr.msra.gmra.mrb[0].mxu0 %vm142_vm0, %v108_v22  ;;  %2593 = vmatprep.subr.bf16.mxu1 %v3300_v23  ;;  %v3319_v33 = vpack.c.bf16 %v128_v32, %v126_v31  ;;  %vm103_vm3 = vcmp.ge.s32.totalorder %v89_v62, 64  ;;  %vm105_vm4 = vcmp.lt.s32.totalorder %v89_v62, 96 }
  0x42   :  { %219 = vmatprep.mubr.f32.mxu0 %v3164_v1  ;;  %2603 = vmatpush1.bf16.msra.mxu0 %v3283_v9  ;;  %vm3368_vm6 = vmand %vm103_vm3, %vm105_vm4 }
  0x43   :  { %2605 = vmatprep.subr.bf16.mxu0 %v3293_v18 }
  0x44   :  { %2595 = vmatpush1.bf16.msra.mxu1 %v3306_v28 }
  0x45   :  { %2529 = vmatmul.mubr.msk.f32.gmra.mrb[2].mxu0 %vm142_vm0, %v109_v29  ;;  %2597 = vmatprep.subr.bf16.mxu1 %v3313_v30 }
  0x46   :  { %421 = vmatprep.mubr.f32.mxu0 %v3164_v1  ;;  %2607 = vmatpush1.bf16.msra.mxu0 %v3295_v19 }
  0x47   :  { %2609 = vmatprep.subr.bf16.mxu0 %v3300_v23 }
  0x48   :  { %2599 = vmatpush1.bf16.msra.mxu1 %v3319_v33 }
  0x49   :  { %2617 = vmatprep.subr.bf16.mxu1 %v3275_v5 }
  0x4a   :  { %2611 = vmatpush1.bf16.msra.mxu0 %v3306_v28 }
  0x4b   :  { %298 = vmatmul.mubr.f32.vlgmr.msra.gmra.mrb[0].mxu1 %v3164_v1  ;;  %2613 = vmatprep.subr.bf16.mxu0 %v3313_v30 }
  0x4c   :  { %2619 = vmatpush1.bf16.msra.mxu1 %v3283_v9  ;;  %552 = vmatprep.mubr.f32.mxu1 %v3164_v1 }
  0x4d   :  { %2621 = vmatprep.subr.bf16.mxu1 %v3293_v18 }
  0x4e   :  { %2615 = vmatpush1.bf16.msra.mxu0 %v3319_v33 }
  0x4f   :  { %2633 = vmatprep.subr.bf16.mxu0 %v3275_v5 }
  0x50   :  { %2623 = vmatpush1.bf16.msra.mxu1 %v3295_v19 }
  0x51   :  { %2625 = vmatprep.subr.bf16.mxu1 %v3300_v23 }
  0x54   :  { %2627 = vmatpush1.bf16.msra.mxu1 %v3306_v28 }
  0x55   :  { %2629 = vmatprep.subr.bf16.mxu1 %v3313_v30 }
  0x58   :  { %2631 = vmatpush1.bf16.msra.mxu1 %v3319_v33 }
  0x59   :  { %2649 = vmatprep.subr.bf16.mxu1 %v3275_v5 }
 0x114   :  { %v215_v40 = vpop.f32.mrb[0].mxu0 }
 0x115   :  { %v217_v41 = vpop.f32.mrb[1].mxu0  ;;  %v3359_v49 = vadd.f32 %v215_v40, %v135_v43 }
 0x116   :  { %v3350_v42 = vadd.f32 %v217_v41, %v139_v38 }
 0x118   :  { %v221_v44 = vpop.f32.mrb[2].mxu0 }
 0x119   :  { %v3354_v45 = vadd.f32 %v221_v44, %v135_v43  ;;  %v223_v46 = vpop.f32.mrb[3].mxu0 }
 0x11a   :  { %v3356_v47 = vadd.f32 %v223_v46, %v139_v38 }
 0x11c   :  { %v227_v48 = vrot.slane %v3356_v47, 6  ;;  %v352_v34 = vrot.slane %v3356_v47, 2 }
 0x11e   :  { %v299_v50 = vpop.f32.mrb[0].mxu1 }
 0x11f   :  { %v304_v51 = vadd.f32 %v299_v50, %v3359_v49  ;;  %v301_v52 = vpop.f32.mrb[1].mxu1 }
 0x120   :  { %v305_v53 = vadd.f32 %v301_v52, %v227_v48 }
 0x121   :  { %v2530_v54 = vmul.f32 -1.442695, %v304_v51 }
 0x122   :  { %v2531_v55 = vmul.f32 -1.442695, %v305_v53 }
 0x123   :  { %2865 = vpow2.f32 %v2530_v54 }
 0x124   :  { %2867 = vpow2.f32 %v2531_v55 }
 0x125   :  { %2869 = vtanh.f32 %v304_v51 }
 0x126   :  { %2871 = vtanh.f32 %v305_v53 }
 0x12d   :  { %v2866_v57 = vpop.eup %2865 }
 0x12e   :  { %v2868_v58 = vpop.eup %2867  ;;  %v314_v60 = vadd.f32 1.0, %v2866_v57 }
 0x12f   :  { %v315_v61 = vadd.f32 1.0, %v2868_v58  ;;  %v2870_v63 = vpop.eup %2869 }
 0x130   :  { %2873 = vrcp.f32 %v314_v60  ;;  %v2872_v2 = vpop.eup %2871 }
 0x131   :  { %2875 = vrcp.f32 %v315_v61 }
 0x13a   :  { %v2874_v4 = vpop.eup %2873 }
 0x13b   :  { %v2876_v6 = vpop.eup %2875  ;;  %v320_v7 = vsel %vm3364_vm5, %v2870_v63, %v2874_v4 }
 0x13c   :  { %333 = vrot.lane.b32.xlu1 %v320_v7, %s3165_s3  ;;  %v321_v8 = vsel %vm3368_vm6, %v2872_v2, %v2876_v6 }
 0x13d   :  { %323 = vrot.lane.b32.xlu0 %v321_v8, %s3166_s12 }
 0x140   :  { %336 = vrot.lane.b32.xlu1 %v321_v8, %s3167_s15 }
 0x141   :  { %329 = vrot.lane.b32.xlu0 %v320_v7, %s3167_s15 }
 0x144   :  { %343 = vrot.lane.b32.xlu1 %v321_v8, %s3165_s3 }
 0x145   :  { %340 = vrot.lane.b32.xlu0 %v320_v7, %s3166_s12 }
 0x1ae   :  { %v334_v10 = vpop.permute.xlu1 %333 }
 0x1af   :  { %v324_v11 = vpop.permute.xlu0 %323 }
 0x1b0   :  { %v327_v13 = vsel %vm326_vm7, %v320_v7, %v324_v11 }
 0x1b2   :  { %v337_v12 = vpop.permute.xlu1 %336 }
 0x1b3   :  { %v339_v14 = vsel %vm326_vm7, %v334_v10, %v337_v12  ;;  %v330_v15 = vpop.permute.xlu0 %329 }
 0x1b4   :  { %v348_v16 = vmul.f32 %v339_v14, %v327_v13  ;;  %v332_v17 = vsel %vm326_vm7, %v330_v15, %v321_v8 }
 0x1b5   :  { %v347_v20 = vmul.f32 0.0, %v332_v17 }
 0x1b6   :  { %v344_v22 = vpop.permute.xlu1 %343 }
 0x1b7   :  { %v349_v21 = vadd.f32 %v348_v16, %v347_v20  ;;  %v341_v24 = vpop.permute.xlu0 %340 }
 0x1b8   :  { %v346_v26 = vsel %vm326_vm7, %v341_v24, %v344_v22 }
 0x1b9   :  { %2877 = vtanh.f32 %v349_v21  ;;  %v477_v62 = vrot.slane %v349_v21, 6 }
 0x1c3   :  { %v2878_v25 = vpop.eup %2877 }
 0x1c4   :  { %v3386_v27 = vmul.f32 %v2878_v25, %v346_v26 }
 0x1c6   :  { %2532 = vmatmul.mubr.msk.f32.vlgmr.msra.gmra.mrb[4].mxu0 %vm229_vm8, %v3386_v27 }
 0x1c7   :  { %2635 = vmatpush1.bf16.msra.mxu0 %v3283_v9  ;;  %683 = vmatprep.mubr.f32.mxu0 %v3164_v1 }
 0x1c8   :  { %2637 = vmatprep.subr.bf16.mxu0 %v3293_v18 }
 0x1cb   :  { %2639 = vmatpush1.bf16.msra.mxu0 %v3295_v19 }
 0x1cc   :  { %2641 = vmatprep.subr.bf16.mxu0 %v3300_v23 }
 0x1cf   :  { %2643 = vmatpush1.bf16.msra.mxu0 %v3306_v28 }
 0x1d0   :  { %2645 = vmatprep.subr.bf16.mxu0 %v3313_v30 }
 0x1d3   :  { %2647 = vmatpush1.bf16.msra.mxu0 %v3319_v33 }
 0x1d4   :  { %2665 = vmatprep.subr.bf16.mxu0 %v3275_v5 }
 0x299   :  { %v423_v29 = vpop.f32.mrb[4].mxu0 }
 0x29a   :  { %v430_v31 = vrot.slane %v423_v29, 6  ;;  %v425_v32 = vpop.f32.mrb[5].mxu0 }
 0x29b   :  { %v431_v37 = vrot.slane %v425_v32, 6 }
 0x29c   :  { %v434_v38 = vadd.f32 %v430_v31, %v3359_v49 }
 0x29d   :  { %v435_v40 = vadd.f32 %v431_v37, %v352_v34 }
 0x29e   :  { %v2533_v41 = vmul.f32 -1.442695, %v434_v38 }
 0x29f   :  { %v2534_v43 = vmul.f32 -1.442695, %v435_v40 }
 0x2a0   :  { %2879 = vpow2.f32 %v2533_v41 }
 0x2a1   :  { %2881 = vpow2.f32 %v2534_v43 }
 0x2a2   :  { %2883 = vtanh.f32 %v434_v38 }
 0x2a3   :  { %2885 = vtanh.f32 %v435_v40 }
 0x2aa   :  { %v2880_v44 = vpop.eup %2879 }
 0x2ab   :  { %v2882_v46 = vpop.eup %2881  ;;  %v444_v50 = vadd.f32 1.0, %v2880_v44 }
 0x2ac   :  { %v445_v51 = vadd.f32 1.0, %v2882_v46  ;;  %v2884_v52 = vpop.eup %2883 }
 0x2ad   :  { %2887 = vrcp.f32 %v444_v50  ;;  %v2886_v53 = vpop.eup %2885 }
 0x2ae   :  { %2889 = vrcp.f32 %v445_v51 }
 0x2b7   :  { %v2888_v54 = vpop.eup %2887 }
 0x2b8   :  { %v2890_v55 = vpop.eup %2889  ;;  %v450_v56 = vsel %vm3364_vm5, %v2884_v52, %v2888_v54 }
 0x2b9   :  { %458 = vrot.lane.b32.xlu1 %v450_v56, %s3167_s15  ;;  %v451_v57 = vsel %vm3368_vm6, %v2886_v53, %v2890_v55 }
 0x2ba   :  { %453 = vrot.lane.b32.xlu0 %v451_v57, %s3166_s12 }
 0x2bd   :  { %465 = vrot.lane.b32.xlu1 %v451_v57, %s3167_s15 }
 0x2be   :  { %462 = vrot.lane.b32.xlu0 %v450_v56, %s3165_s3 }
 0x2c1   :  { %472 = vrot.lane.b32.xlu1 %v451_v57, %s3165_s3 }
 0x2c2   :  { %469 = vrot.lane.b32.xlu0 %v450_v56, %s3166_s12 }
 0x32b   :  { %v459_v58 = vpop.permute.xlu1 %458 }
 0x32c   :  { %v454_v59 = vpop.permute.xlu0 %453  ;;  %v461_v60 = vsel %vm326_vm7, %v459_v58, %v451_v57 }
 0x32d   :  { %v456_v2 = vsel %vm326_vm7, %v450_v56, %v454_v59  ;;  %v479_v6 = vmul.f32 %v477_v62, %v461_v60 }
 0x32f   :  { %v466_v61 = vpop.permute.xlu1 %465 }
 0x330   :  { %v463_v63 = vpop.permute.xlu0 %462 }
 0x331   :  { %v468_v4 = vsel %vm326_vm7, %v463_v63, %v466_v61 }
 0x332   :  { %v480_v7 = vmul.f32 %v468_v4, %v456_v2 }
 0x333   :  { %v473_v10 = vpop.permute.xlu1 %472 }
 0x334   :  { %v481_v8 = vadd.f32 %v480_v7, %v479_v6  ;;  %v470_v11 = vpop.permute.xlu0 %469 }
 0x335   :  { %v475_v13 = vsel %vm326_vm7, %v470_v11, %v473_v10 }
 0x336   :  { %2891 = vtanh.f32 %v481_v8  ;;  %v608_v53 = vrot.slane %v481_v8, 6 }
 0x340   :  { %v2892_v12 = vpop.eup %2891 }
 0x341   :  { %v3417_v14 = vmul.f32 %v2892_v12, %v475_v13 }
 0x343   :  { %v485_v15 = vrot.slane %v3417_v14, 2 }
 0x345   :  { %2535 = vmatmul.mubr.msk.f32.vlgmr.msra.gmra.mrb[2].mxu1 %vm229_vm8, %v485_v15 }
 0x346   :  { %2651 = vmatpush1.bf16.msra.mxu1 %v3283_v9  ;;  %817 = vmatprep.mubr.f32.mxu1 %v3164_v1 }
 0x347   :  { %2653 = vmatprep.subr.bf16.mxu1 %v3293_v18 }
 0x34a   :  { %2655 = vmatpush1.bf16.msra.mxu1 %v3295_v19 }
 0x34b   :  { %2657 = vmatprep.subr.bf16.mxu1 %v3300_v23 }
 0x34e   :  { %2659 = vmatpush1.bf16.msra.mxu1 %v3306_v28 }
 0x34f   :  { %2661 = vmatprep.subr.bf16.mxu1 %v3313_v30 }
 0x352   :  { %2663 = vmatpush1.bf16.msra.mxu1 %v3319_v33 }
 0x353   :  { %2681 = vmatprep.subr.bf16.mxu1 %v3275_v5 }
 0x418   :  { %v554_v16 = vpop.f32.mrb[2].mxu1 }
 0x419   :  { %v561_v17 = vrot.slane %v554_v16, 4  ;;  %v556_v20 = vpop.f32.mrb[3].mxu1 }
 0x41a   :  { %v562_v21 = vrot.slane %v556_v20, 4 }
 0x41b   :  { %v565_v22 = vadd.f32 %v561_v17, %v3359_v49 }
 0x41c   :  { %v566_v24 = vadd.f32 %v562_v21, %v227_v48 }
 0x41d   :  { %v2536_v25 = vmul.f32 -1.442695, %v565_v22 }
 0x41e   :  { %v2537_v26 = vmul.f32 -1.442695, %v566_v24 }
 0x41f   :  { %2893 = vpow2.f32 %v2536_v25 }
 0x420   :  { %2895 = vpow2.f32 %v2537_v26 }
 0x421   :  { %2897 = vtanh.f32 %v565_v22 }
 0x422   :  { %2899 = vtanh.f32 %v566_v24 }
 0x429   :  { %v2894_v29 = vpop.eup %2893 }
 0x42a   :  { %v2896_v31 = vpop.eup %2895  ;;  %v575_v32 = vadd.f32 1.0, %v2894_v29 }
 0x42b   :  { %v576_v37 = vadd.f32 1.0, %v2896_v31  ;;  %v2898_v38 = vpop.eup %2897 }
 0x42c   :  { %2901 = vrcp.f32 %v575_v32  ;;  %v2900_v40 = vpop.eup %2899 }
 0x42d   :  { %2903 = vrcp.f32 %v576_v37 }
 0x436   :  { %v2902_v41 = vpop.eup %2901 }
 0x437   :  { %v2904_v43 = vpop.eup %2903  ;;  %v581_v44 = vsel %vm3364_vm5, %v2898_v38, %v2902_v41 }
 0x438   :  { %589 = vrot.lane.b32.xlu1 %v581_v44, %s3167_s15  ;;  %v582_v48 = vsel %vm3368_vm6, %v2900_v40, %v2904_v43 }
 0x439   :  { %584 = vrot.lane.b32.xlu0 %v582_v48, %s3166_s12 }
 0x43c   :  { %596 = vrot.lane.b32.xlu1 %v582_v48, %s3167_s15 }
 0x43d   :  { %593 = vrot.lane.b32.xlu0 %v581_v44, %s3165_s3 }
 0x440   :  { %603 = vrot.lane.b32.xlu1 %v582_v48, %s3165_s3 }
 0x441   :  { %600 = vrot.lane.b32.xlu0 %v581_v44, %s3166_s12 }
 0x4aa   :  { %v590_v46 = vpop.permute.xlu1 %589 }
 0x4ab   :  { %v585_v50 = vpop.permute.xlu0 %584  ;;  %v592_v51 = vsel %vm326_vm7, %v590_v46, %v582_v48 }
 0x4ac   :  { %v587_v55 = vsel %vm326_vm7, %v581_v44, %v585_v50  ;;  %v610_v57 = vmul.f32 %v608_v53, %v592_v51 }
 0x4ae   :  { %v597_v52 = vpop.permute.xlu1 %596 }
 0x4af   :  { %v594_v54 = vpop.permute.xlu0 %593 }
 0x4b0   :  { %v599_v56 = vsel %vm326_vm7, %v594_v54, %v597_v52 }
 0x4b1   :  { %v611_v58 = vmul.f32 %v599_v56, %v587_v55  ;;  %v747_v55 = vrot.slane %v3350_v42, 6 }
 0x4b2   :  { %v604_v60 = vpop.permute.xlu1 %603 }
 0x4b3   :  { %v612_v59 = vadd.f32 %v611_v58, %v610_v57  ;;  %v601_v61 = vpop.permute.xlu0 %600 }
 0x4b4   :  { %v606_v63 = vsel %vm326_vm7, %v601_v61, %v604_v60 }
 0x4b5   :  { %2905 = vtanh.f32 %v612_v59  ;;  %v739_v32 = vrot.slane %v612_v59, 6 }
 0x4bf   :  { %v2906_v62 = vpop.eup %2905 }
 0x4c0   :  { %v3447_v2 = vmul.f32 %v2906_v62, %v606_v63 }
 0x4c2   :  { %v616_v4 = vrot.slane %v3447_v2, 4 }
 0x4c4   :  { %2538 = vmatmul.mubr.msk.f32.vlgmr.msra.gmra.mrb[6].mxu0 %vm229_vm8, %v616_v4 }
 0x4c5   :  { %2667 = vmatpush1.bf16.msra.mxu0 %v3283_v9  ;;  %943 = vmatprep.mubr.f32.mxu0 %v3164_v1 }
 0x4c6   :  { %2669 = vmatprep.subr.bf16.mxu0 %v3293_v18 }
 0x4c9   :  { %2671 = vmatpush1.bf16.msra.mxu0 %v3295_v19 }
 0x4ca   :  { %2673 = vmatprep.subr.bf16.mxu0 %v3300_v23 }
 0x4cd   :  { %2675 = vmatpush1.bf16.msra.mxu0 %v3306_v28 }
 0x4ce   :  { %2677 = vmatprep.subr.bf16.mxu0 %v3313_v30 }
 0x4d1   :  { %2679 = vmatpush1.bf16.msra.mxu0 %v3319_v33 }
 0x4d2   :  { %2697 = vmatprep.subr.bf16.mxu0 %v3275_v5 }
 0x597   :  { %v685_v6 = vpop.f32.mrb[6].mxu0 }
 0x598   :  { %v692_v7 = vrot.slane %v685_v6, 2  ;;  %v687_v8 = vpop.f32.mrb[7].mxu0 }
 0x599   :  { %v693_v10 = vrot.slane %v687_v8, 2 }
 0x59a   :  { %v696_v11 = vadd.f32 %v692_v7, %v3359_v49 }
 0x59b   :  { %v697_v12 = vadd.f32 %v693_v10, %v352_v34 }
 0x59c   :  { %v2539_v13 = vmul.f32 -1.442695, %v696_v11 }
 0x59d   :  { %v2540_v15 = vmul.f32 -1.442695, %v697_v12 }
 0x59e   :  { %2907 = vpow2.f32 %v2539_v13 }
 0x59f   :  { %2909 = vpow2.f32 %v2540_v15 }
 0x5a0   :  { %2911 = vtanh.f32 %v696_v11 }
 0x5a1   :  { %2913 = vtanh.f32 %v697_v12 }
 0x5a8   :  { %v2908_v16 = vpop.eup %2907 }
 0x5a9   :  { %v2910_v17 = vpop.eup %2909  ;;  %v706_v20 = vadd.f32 1.0, %v2908_v16 }
 0x5aa   :  { %v707_v21 = vadd.f32 1.0, %v2910_v17  ;;  %v2912_v5 = vpop.eup %2911 }
 0x5ab   :  { %2915 = vrcp.f32 %v706_v20  ;;  %v2914_v22 = vpop.eup %2913 }
 0x5ac   :  { %2917 = vrcp.f32 %v707_v21 }
 0x5b5   :  { %v2916_v24 = vpop.eup %2915 }
 0x5b6   :  { %v2918_v25 = vpop.eup %2917  ;;  %v712_v47 = vsel %vm3364_vm5, %v2912_v5, %v2916_v24 }
 0x5b7   :  { %720 = vrot.lane.b32.xlu1 %v712_v47, %s3167_s15  ;;  %v713_v49 = vsel %vm3368_vm6, %v2914_v22, %v2918_v25 }
 0x5b8   :  { %715 = vrot.lane.b32.xlu0 %v713_v49, %s3166_s12 }
 0x5bb   :  { %727 = vrot.lane.b32.xlu1 %v713_v49, %s3167_s15 }
 0x5bc   :  { %724 = vrot.lane.b32.xlu0 %v712_v47, %s3165_s3 }
 0x5bf   :  { %734 = vrot.lane.b32.xlu1 %v713_v49, %s3165_s3 }
 0x5c0   :  { %731 = vrot.lane.b32.xlu0 %v712_v47, %s3166_s12 }
 0x629   :  { %v721_v34 = vpop.permute.xlu1 %720 }
 0x62a   :  { %v716_v26 = vpop.permute.xlu0 %715  ;;  %v723_v29 = vsel %vm326_vm7, %v721_v34, %v713_v49 }
 0x62b   :  { %v718_v38 = vsel %vm326_vm7, %v712_v47, %v716_v26  ;;  %v741_v41 = vmul.f32 %v739_v32, %v723_v29 }
 0x62d   :  { %v728_v31 = vpop.permute.xlu1 %727 }
 0x62e   :  { %v725_v37 = vpop.permute.xlu0 %724 }
 0x62f   :  { %v730_v40 = vsel %vm326_vm7, %v725_v37, %v728_v31 }
 0x630   :  { %v742_v43 = vmul.f32 %v730_v40, %v718_v38  ;;  %v874_v40 = vrot.slane %v3350_v42, 2  ;;  %v1301_v42 = vld [vmem:[#allocation5] sm:$0xff] }
 0x631   :  { %v735_v48 = vpop.permute.xlu1 %734 }
 0x632   :  { %v743_v44 = vadd.f32 %v742_v43, %v741_v41  ;;  %v732_v46 = vpop.permute.xlu0 %731 }
 0x633   :  { %v737_v51 = vsel %vm326_vm7, %v732_v46, %v735_v48 }
 0x634   :  { %2919 = vtanh.f32 %v743_v44  ;;  %v867_v20 = vrot.slane %v743_v44, 6 }
 0x63e   :  { %v2920_v50 = vpop.eup %2919 }
 0x63f   :  { %v3477_v52 = vmul.f32 %v2920_v50, %v737_v51 }
 0x641   :  { %v750_v53 = vrot.slane %v3477_v52, 6 }
 0x643   :  { %2541 = vmatmul.mubr.msk.f32.vlgmr.msra.gmra.mrb[4].mxu1 %vm229_vm8, %v750_v53 }
 0x644   :  { %2683 = vmatpush1.bf16.msra.mxu1 %v3283_v9  ;;  %1074 = vmatprep.mubr.f32.mxu1 %v3164_v1 }
 0x645   :  { %2685 = vmatprep.subr.bf16.mxu1 %v3293_v18 }
 0x648   :  { %2687 = vmatpush1.bf16.msra.mxu1 %v3295_v19 }
 0x649   :  { %2689 = vmatprep.subr.bf16.mxu1 %v3300_v23 }
 0x64c   :  { %2691 = vmatpush1.bf16.msra.mxu1 %v3306_v28 }
 0x64d   :  { %2693 = vmatprep.subr.bf16.mxu1 %v3313_v30 }
 0x650   :  { %2695 = vmatpush1.bf16.msra.mxu1 %v3319_v33 }
 0x716   :  { %v819_v54 = vpop.f32.mrb[4].mxu1 }
 0x717   :  { %v824_v56 = vadd.f32 %v819_v54, %v3354_v45  ;;  %v821_v57 = vpop.f32.mrb[5].mxu1 }
 0x718   :  { %v825_v58 = vadd.f32 %v821_v57, %v747_v55 }
 0x719   :  { %v2542_v59 = vmul.f32 -1.442695, %v824_v56 }
 0x71a   :  { %v2543_v60 = vmul.f32 -1.442695, %v825_v58 }
 0x71b   :  { %2921 = vpow2.f32 %v2542_v59 }
 0x71c   :  { %2923 = vpow2.f32 %v2543_v60 }
 0x71d   :  { %2925 = vtanh.f32 %v824_v56 }
 0x71e   :  { %2927 = vtanh.f32 %v825_v58 }
 0x725   :  { %v2922_v61 = vpop.eup %2921 }
 0x726   :  { %v2924_v62 = vpop.eup %2923  ;;  %v834_v63 = vadd.f32 1.0, %v2922_v61 }
 0x727   :  { %v835_v4 = vadd.f32 1.0, %v2924_v62  ;;  %v2926_v6 = vpop.eup %2925 }
 0x728   :  { %2929 = vrcp.f32 %v834_v63  ;;  %v2928_v7 = vpop.eup %2927 }
 0x729   :  { %2931 = vrcp.f32 %v835_v4 }
 0x732   :  { %v2930_v8 = vpop.eup %2929 }
 0x733   :  { %v2932_v10 = vpop.eup %2931  ;;  %v840_v11 = vsel %vm3364_vm5, %v2926_v6, %v2930_v8 }
 0x734   :  { %848 = vrot.lane.b32.xlu1 %v840_v11, %s3167_s15  ;;  %v841_v12 = vsel %vm3368_vm6, %v2928_v7, %v2932_v10 }
 0x735   :  { %843 = vrot.lane.b32.xlu0 %v841_v12, %s3166_s12 }
 0x738   :  { %855 = vrot.lane.b32.xlu1 %v841_v12, %s3167_s15 }
 0x739   :  { %852 = vrot.lane.b32.xlu0 %v840_v11, %s3165_s3 }
 0x73c   :  { %862 = vrot.lane.b32.xlu1 %v841_v12, %s3165_s3 }
 0x73d   :  { %859 = vrot.lane.b32.xlu0 %v840_v11, %s3166_s12 }
 0x7a6   :  { %v849_v13 = vpop.permute.xlu1 %848 }
 0x7a7   :  { %v844_v15 = vpop.permute.xlu0 %843  ;;  %v851_v16 = vsel %vm326_vm7, %v849_v13, %v841_v12  ;;  %v1283_v13 = vrot.slane %v3447_v2, 2 }
 0x7a8   :  { %v846_v5 = vsel %vm326_vm7, %v840_v11, %v844_v15  ;;  %v869_v24 = vmul.f32 %v867_v20, %v851_v16 }
 0x7aa   :  { %v856_v17 = vpop.permute.xlu1 %855 }
 0x7ab   :  { %v853_v21 = vpop.permute.xlu0 %852 }
 0x7ac   :  { %v858_v22 = vsel %vm326_vm7, %v853_v21, %v856_v17 }
 0x7ad   :  { %v870_v25 = vmul.f32 %v858_v22, %v846_v5 }
 0x7ae   :  { %v863_v49 = vpop.permute.xlu1 %862 }
 0x7af   :  { %v871_v47 = vadd.f32 %v870_v25, %v869_v24  ;;  %v860_v34 = vpop.permute.xlu0 %859 }
 0x7b0   :  { %v865_v29 = vsel %vm326_vm7, %v860_v34, %v863_v49 }
 0x7b1   :  { %2933 = vtanh.f32 %v871_v47  ;;  %v999_v60 = vrot.slane %v871_v47, 6 }
 0x7bb   :  { %v2934_v26 = vpop.eup %2933 }
 0x7bc   :  { %v3509_v31 = vmul.f32 %v2934_v26, %v865_v29 }
 0x7be   :  { %2544 = vmatmul.mubr.msk.f32.vlgmr.msra.gmra.mrb[8].mxu0 %vm229_vm8, %v3509_v31  ;;  %v1282_v16 = vsel %vm326_vm7, %v3509_v31, %v750_v53 }
 0x7bf   :  { %2699 = vmatpush1.bf16.msra.mxu0 %v3283_v9  ;;  %1205 = vmatprep.mubr.f32.mxu0 %v3164_v1 }
 0x7c0   :  { %2701 = vmatprep.subr.bf16.mxu0 %v3293_v18 }
 0x7c3   :  { %2703 = vmatpush1.bf16.msra.mxu0 %v3295_v19 }
 0x7c4   :  { %2705 = vmatprep.subr.bf16.mxu0 %v3300_v23 }
 0x7c7   :  { %2707 = vmatpush1.bf16.msra.mxu0 %v3306_v28 }
 0x7c8   :  { %2709 = vmatprep.subr.bf16.mxu0 %v3313_v30 }
 0x7cb   :  { %2711 = vmatpush1.bf16.msra.mxu0 %v3319_v33 }
 0x891   :  { %v945_v32 = vpop.f32.mrb[8].mxu0 }
 0x892   :  { %v952_v37 = vrot.slane %v945_v32, 6  ;;  %v947_v38 = vpop.f32.mrb[9].mxu0 }
 0x893   :  { %v953_v9 = vrot.slane %v947_v38, 6 }
 0x894   :  { %v956_v41 = vadd.f32 %v952_v37, %v3354_v45 }
 0x895   :  { %v957_v18 = vadd.f32 %v953_v9, %v874_v40 }
 0x896   :  { %v2545_v19 = vmul.f32 -1.442695, %v956_v41 }
 0x897   :  { %v2546_v43 = vmul.f32 -1.442695, %v957_v18 }
 0x898   :  { %2935 = vpow2.f32 %v2545_v19 }
 0x899   :  { %2937 = vpow2.f32 %v2546_v43 }
 0x89a   :  { %2939 = vtanh.f32 %v956_v41 }
 0x89b   :  { %2941 = vtanh.f32 %v957_v18 }
 0x8a2   :  { %v2936_v23 = vpop.eup %2935 }
 0x8a3   :  { %v2938_v28 = vpop.eup %2937  ;;  %v966_v30 = vadd.f32 1.0, %v2936_v23 }
 0x8a4   :  { %v967_v33 = vadd.f32 1.0, %v2938_v28  ;;  %v2940_v44 = vpop.eup %2939 }
 0x8a5   :  { %2943 = vrcp.f32 %v966_v30  ;;  %v2942_v48 = vpop.eup %2941 }
 0x8a6   :  { %2945 = vrcp.f32 %v967_v33 }
 0x8af   :  { %v2944_v46 = vpop.eup %2943 }
 0x8b0   :  { %v2946_v50 = vpop.eup %2945  ;;  %v972_v51 = vsel %vm3364_vm5, %v2940_v44, %v2944_v46 }
 0x8b1   :  { %980 = vrot.lane.b32.xlu1 %v972_v51, %s3167_s15  ;;  %v973_v54 = vsel %vm3368_vm6, %v2942_v48, %v2946_v50 }
 0x8b2   :  { %975 = vrot.lane.b32.xlu0 %v973_v54, %s3166_s12 }
 0x8b5   :  { %987 = vrot.lane.b32.xlu1 %v973_v54, %s3167_s15 }
 0x8b6   :  { %984 = vrot.lane.b32.xlu0 %v972_v51, %s3165_s3 }
 0x8b9   :  { %994 = vrot.lane.b32.xlu1 %v973_v54, %s3165_s3 }
 0x8ba   :  { %991 = vrot.lane.b32.xlu0 %v972_v51, %s3166_s12 }
 0x923   :  { %v981_v56 = vpop.permute.xlu1 %980 }
 0x924   :  { %v976_v57 = vpop.permute.xlu0 %975  ;;  %v983_v58 = vsel %vm326_vm7, %v981_v56, %v973_v54 }
 0x925   :  { %v978_v62 = vsel %vm326_vm7, %v972_v51, %v976_v57  ;;  %v1001_v4 = vmul.f32 %v999_v60, %v983_v58  ;;  %v1286_v60 = vrot.slane %v3417_v14, 6 }
 0x927   :  { %v988_v59 = vpop.permute.xlu1 %987 }
 0x928   :  { %v985_v61 = vpop.permute.xlu0 %984 }
 0x929   :  { %v990_v63 = vsel %vm326_vm7, %v985_v61, %v988_v59 }
 0x92a   :  { %v1002_v6 = vmul.f32 %v990_v63, %v978_v62 }
 0x92b   :  { %v995_v8 = vpop.permute.xlu1 %994 }
 0x92c   :  { %v1003_v7 = vadd.f32 %v1002_v6, %v1001_v4  ;;  %v992_v10 = vpop.permute.xlu0 %991 }
 0x92d   :  { %v997_v12 = vsel %vm326_vm7, %v992_v10, %v995_v8 }
 0x92e   :  { %2947 = vtanh.f32 %v1003_v7  ;;  %v1130_v33 = vrot.slane %v1003_v7, 6 }
 0x938   :  { %v2948_v11 = vpop.eup %2947 }
 0x939   :  { %v3540_v15 = vmul.f32 %v2948_v11, %v997_v12 }
 0x93b   :  { %v1007_v17 = vrot.slane %v3540_v15, 2  ;;  %v1285_v20 = vsel %vm326_vm7, %v3540_v15, %v1283_v13 }
 0x93c   :  { %v1298_v21 = vsel %vm1292_vm9, %v1282_v16, %v1285_v20 }
 0x93d   :  { %2547 = vmatmul.mubr.msk.f32.vlgmr.msra.gmra.mrb[6].mxu1 %vm229_vm8, %v1007_v17 }
 0x93e   :  { %1415 = vmatprep.mubr.f32.mxu1 %v3164_v1 }
 0xa10   :  { %v1076_v5 = vpop.f32.mrb[6].mxu1 }
 0xa11   :  { %v1083_v22 = vrot.slane %v1076_v5, 4  ;;  %v1078_v24 = vpop.f32.mrb[7].mxu1 }
 0xa12   :  { %v1084_v25 = vrot.slane %v1078_v24, 4 }
 0xa13   :  { %v1087_v47 = vadd.f32 %v1083_v22, %v3354_v45 }
 0xa14   :  { %v1088_v53 = vadd.f32 %v1084_v25, %v747_v55  ;;  %v1302_v25 = vld [vmem:[#allocation5 + $0x8] sm:$0xff] }
 0xa15   :  { %v2548_v49 = vmul.f32 -1.442695, %v1087_v47 }
 0xa16   :  { %v2549_v34 = vmul.f32 -1.442695, %v1088_v53 }
 0xa17   :  { %2949 = vpow2.f32 %v2548_v49 }
 0xa18   :  { %2951 = vpow2.f32 %v2549_v34 }
 0xa19   :  { %2953 = vtanh.f32 %v1087_v47  ;;  %v1304_v47 = vld [vmem:[#allocation5 + $0x18] sm:$0xff] }
 0xa1a   :  { %2955 = vtanh.f32 %v1088_v53  ;;  %v2712_v53 = vpack.c.bf16 %v1304_v47, %v1302_v25  ;;  %v1329_v25 = vld [vmem:[#allocation7 + $0x60] sm:$0xff]  ;;  %v1331_v47 = vld [vmem:[#allocation7 + $0x70] sm:$0xff] }
 0xa1c   :  { %2713 = vmatprep.subr.bf16.mxu1 %v2712_v53 }
 0xa21   :  { %v2950_v26 = vpop.eup %2949 }
 0xa22   :  { %v2952_v29 = vpop.eup %2951  ;;  %v1097_v32 = vadd.f32 1.0, %v2950_v26 }
 0xa23   :  { %v1098_v37 = vadd.f32 1.0, %v2952_v29  ;;  %v2954_v38 = vpop.eup %2953  ;;  %v1318_v29 = vld [vmem:[#allocation7 + $0x8] sm:$0xff] }
 0xa24   :  { %2957 = vrcp.f32 %v1097_v32  ;;  %v2956_v9 = vpop.eup %2955  ;;  %v1320_v32 = vld [vmem:[#allocation7 + $0x18] sm:$0xff] }
 0xa25   :  { %2959 = vrcp.f32 %v1098_v37 }
 0xa2e   :  { %v2958_v41 = vpop.eup %2957 }
 0xa2f   :  { %v2960_v18 = vpop.eup %2959  ;;  %v1103_v19 = vsel %vm3364_vm5, %v2954_v38, %v2958_v41  ;;  %v3596_v38 = vpack.c.bf16 %v1320_v32, %v1318_v29  ;;  %v1319_v41 = vld [vmem:[#allocation7 + $0x10] sm:$0xff] }
 0xa30   :  { %1111 = vrot.lane.b32.xlu1 %v1103_v19, %s3167_s15  ;;  %v1104_v55 = vsel %vm3368_vm6, %v2956_v9, %v2960_v18  ;;  %v1317_v9 = vld [vmem:[#allocation7] sm:$0xff] }
 0xa31   :  { %1106 = vrot.lane.b32.xlu0 %v1104_v55, %s3166_s12  ;;  %v3600_v18 = vpack.c.bf16 %v1319_v41, %v1317_v9  ;;  %2729 = vmatprep.subr.bf16.mxu0 %v3596_v38 }
 0xa34   :  { %1118 = vrot.lane.b32.xlu1 %v1104_v55, %s3167_s15 }
 0xa35   :  { %1115 = vrot.lane.b32.xlu0 %v1103_v19, %s3165_s3 }
 0xa38   :  { %1125 = vrot.lane.b32.xlu1 %v1104_v55, %s3165_s3 }
 0xa39   :  { %1122 = vrot.lane.b32.xlu0 %v1103_v19, %s3166_s12 }
 0xaa2   :  { %v1112_v43 = vpop.permute.xlu1 %1111 }
 0xaa3   :  { %v1107_v23 = vpop.permute.xlu0 %1106  ;;  %v1114_v28 = vsel %vm326_vm7, %v1112_v43, %v1104_v55  ;;  %v1308_v55 = vld [vmem:[#allocation5 + $0x38] sm:$0xff] }
 0xaa4   :  { %v1109_v48 = vsel %vm326_vm7, %v1103_v19, %v1107_v23  ;;  %v1132_v50 = vmul.f32 %v1130_v33, %v1114_v28  ;;  %v1306_v19 = vld [vmem:[#allocation5 + $0x28] sm:$0xff]  ;;  %v1305_v23 = vld [vmem:[#allocation5 + $0x20] sm:$0xff]  ;;  %v1307_v28 = vld [vmem:[#allocation5 + $0x30] sm:$0xff] }
 0xaa5   :  { %v2716_v43 = vpack.c.bf16 %v1308_v55, %v1306_v19  ;;  %v1322_v33 = vld [vmem:[#allocation7 + $0x28] sm:$0xff] }
 0xaa6   :  { %v1119_v30 = vpop.permute.xlu1 %1118 }
 0xaa7   :  { %v1116_v44 = vpop.permute.xlu0 %1115 }
 0xaa8   :  { %v1121_v46 = vsel %vm326_vm7, %v1116_v44, %v1119_v30  ;;  %v2718_v30 = vpack.c.bf16 %v1307_v28, %v1305_v23  ;;  %v1324_v44 = vld [vmem:[#allocation7 + $0x38] sm:$0xff] }
 0xaa9   :  { %v1133_v51 = vmul.f32 %v1121_v46, %v1109_v48  ;;  %v3606_v48 = vpack.c.bf16 %v1324_v44, %v1322_v33  ;;  %v1321_v46 = vld [vmem:[#allocation7 + $0x20] sm:$0xff]  ;;  %v1275_v44 = vrot.slane %v3540_v15, 6 }
 0xaaa   :  { %v1126_v56 = vpop.permute.xlu1 %1125 }
 0xaab   :  { %v3568_v54 = vadd.f32 %v1133_v51, %v1132_v50  ;;  %v1123_v57 = vpop.permute.xlu0 %1122  ;;  %v1323_v50 = vld [vmem:[#allocation7 + $0x30] sm:$0xff] }
 0xaac   :  { %v1128_v59 = vsel %vm326_vm7, %v1123_v57, %v1126_v56  ;;  %v3610_v51 = vpack.c.bf16 %v1323_v50, %v1321_v46  ;;  %v1310_v56 = vld [vmem:[#allocation5 + $0x48] sm:$0xff]  ;;  %v1312_v57 = vld [vmem:[#allocation5 + $0x58] sm:$0xff] }
 0xaad   :  { %2961 = vtanh.f32 %v3568_v54 }
 0xab7   :  { %v2962_v58 = vpop.eup %2961 }
 0xab8   :  { %v3573_v61 = vmul.f32 %v2962_v58, %v1128_v59  ;;  %v2720_v58 = vpack.c.bf16 %v1312_v57, %v1310_v56  ;;  %v1309_v59 = vld [vmem:[#allocation5 + $0x40] sm:$0xff] }
 0xaba   :  { %v1138_v62 = vrot.slane %v3573_v61, 4  ;;  %v1288_v63 = vsel %vm326_vm7, %v3573_v61, %v1286_v60  ;;  %v1311_v60 = vld [vmem:[#allocation5 + $0x50] sm:$0xff]  ;;  %v1272_v33 = vrot.slane %v3573_v61, 2  ;;  %v1277_v61 = vsel %vm326_vm7, %v3447_v2, %v1275_v44  ;;  %v1333_v2 = vld [vmem:[%s3953_s6] sm:$0x3] }
 0xabb   :  { %v3579_v4 = vsel %vm1294_vm10, %v1298_v21, %v1288_v63  ;;  %v1326_v63 = vld [vmem:[#allocation7 + $0x48] sm:$0xff] }
 0xabc   :  { %2550 = vmatmul.mubr.msk.f32.vlgmr.msra.gmra.mrb[10].mxu0 %vm229_vm8, %v1138_v62  ;;  %v2722_v62 = vpack.c.bf16 %v1311_v60, %v1309_v59  ;;  %v1274_v57 = vsel %vm326_vm7, %v3417_v14, %v1272_v33 }
 0xabd   :  { %1495 = vmatprep.mubr.f32.mxu0 %v3164_v1  ;;  %2731 = vmatpush1.bf16.msra.mxu0 %v3600_v18 }
 0xabe   :  { %2733 = vmatprep.subr.bf16.mxu0 %v3606_v48 }
 0xac1   :  { %2735 = vmatpush1.bf16.msra.mxu0 %v3610_v51 }
 0xb8f   :  { %v1207_v6 = vpop.f32.mrb[10].mxu0 }
 0xb90   :  { %v1214_v7 = vrot.slane %v1207_v6, 2  ;;  %v1209_v8 = vpop.f32.mrb[11].mxu0  ;;  %v1328_v6 = vld [vmem:[#allocation7 + $0x58] sm:$0xff] }
 0xb91   :  { %v1215_v10 = vrot.slane %v1209_v8, 2  ;;  %v1325_v8 = vld [vmem:[#allocation7 + $0x40] sm:$0xff] }
 0xb92   :  { %v1218_v11 = vadd.f32 %v1214_v7, %v3354_v45  ;;  %v3616_v7 = vpack.c.bf16 %v1328_v6, %v1326_v63 }
 0xb93   :  { %v1219_v12 = vadd.f32 %v1215_v10, %v874_v40  ;;  %v1303_v40 = vld [vmem:[#allocation5 + $0x10] sm:$0xff] }
 0xb94   :  { %v2551_v13 = vmul.f32 -1.442695, %v1218_v11  ;;  %v2714_v26 = vpack.c.bf16 %v1303_v40, %v1301_v42  ;;  %v1327_v10 = vld [vmem:[#allocation7 + $0x50] sm:$0xff]  ;;  %2737 = vmatprep.subr.bf16.mxu0 %v3616_v7 }
 0xb95   :  { %v2552_v16 = vmul.f32 -1.442695, %v1219_v12 }
 0xb96   :  { %2963 = vpow2.f32 %v2551_v13  ;;  %2715 = vmatpush1.bf16.msra.mxu1 %v2714_v26  ;;  %v1316_v13 = vld [vmem:[#allocation5 + $0x78] sm:$0xff]  ;;  %v1261_v26 = vrot.slane %v3568_v54, 6 }
 0xb97   :  { %2965 = vpow2.f32 %v2552_v16  ;;  %2717 = vmatprep.subr.bf16.mxu1 %v2716_v43 }
 0xb98   :  { %2967 = vtanh.f32 %v1218_v11  ;;  %v3620_v11 = vpack.c.bf16 %v1327_v10, %v1325_v8 }
 0xb99   :  { %2969 = vtanh.f32 %v1219_v12  ;;  %v1314_v12 = vld [vmem:[#allocation5 + $0x68] sm:$0xff] }
 0xb9a   :  { %2719 = vmatpush1.bf16.msra.mxu1 %v2718_v30  ;;  %v2724_v16 = vpack.c.bf16 %v1316_v13, %v1314_v12  ;;  %2739 = vmatpush1.bf16.msra.mxu0 %v3620_v11 }
 0xb9b   :  { %2721 = vmatprep.subr.bf16.mxu1 %v2720_v58 }
 0xb9e   :  { %2723 = vmatpush1.bf16.msra.mxu1 %v2722_v62 }
 0xb9f   :  { %2725 = vmatprep.subr.bf16.mxu1 %v2724_v16 }
 0xba0   :  { %v2964_v17 = vpop.eup %2963 }
 0xba1   :  { %v2966_v20 = vpop.eup %2965  ;;  %v1228_v21 = vadd.f32 1.0, %v2964_v17  ;;  %v1313_v17 = vld [vmem:[#allocation5 + $0x60] sm:$0xff] }
 0xba2   :  { %v1229_v5 = vadd.f32 1.0, %v2966_v20  ;;  %v2968_v22 = vpop.eup %2967  ;;  %v1315_v20 = vld [vmem:[#allocation5 + $0x70] sm:$0xff] }
 0xba3   :  { %2971 = vrcp.f32 %v1228_v21  ;;  %v2970_v24 = vpop.eup %2969  ;;  %v2726_v21 = vpack.c.bf16 %v1315_v20, %v1313_v17 }
 0xba4   :  { %2973 = vrcp.f32 %v1229_v5  ;;  %v1330_v5 = vld [vmem:[#allocation7 + $0x68] sm:$0xff] }
 0xba5   :  { %2727 = vmatpush1.bf16.msra.mxu1 %v2726_v21 }
 0xba6   :  { %2745 = vmatprep.subr.bf16.mxu1 %v3596_v38 }
 0xbad   :  { %v2972_v45 = vpop.eup %2971 }
 0xbae   :  { %v2974_v49 = vpop.eup %2973  ;;  %v3588_v34 = vsel %vm3364_vm5, %v2968_v22, %v2972_v45  ;;  %v1332_v22 = vld [vmem:[#allocation7 + $0x78] sm:$0xff]  ;;  %v3626_v45 = vpack.c.bf16 %v1331_v47, %v1329_v25 }
 0xbaf   :  { %1242 = vrot.lane.b32.xlu1 %v3588_v34, %s3167_s15  ;;  %v3594_v37 = vsel %vm3368_vm6, %v2970_v24, %v2974_v49  ;;  %v3624_v24 = vpack.c.bf16 %v1332_v22, %v1330_v5 }
 0xbb0   :  { %1237 = vrot.lane.b32.xlu0 %v3594_v37, %s3166_s12 }
 0xbb1   :  { %2741 = vmatprep.subr.bf16.mxu0 %v3624_v24 }
 0xbb2   :  { %2743 = vmatpush1.bf16.msra.mxu0 %v3626_v45 }
 0xbb3   :  { %1249 = vrot.lane.b32.xlu1 %v3594_v37, %s3167_s15  ;;  %2761 = vmatprep.subr.bf16.mxu0 %v3596_v38 }
 0xbb4   :  { %1246 = vrot.lane.b32.xlu0 %v3588_v34, %s3165_s3 }
 0xbb5   :  { %1496 = vmatmul.mubr.f32.vlgmr.msra.gmra.mrb[12].mxu0 %v3164_v1 }
 0xbb6   :  { %2763 = vmatpush1.bf16.msra.mxu0 %v3600_v18  ;;  %1749 = vmatprep.mubr.f32.mxu0 %v3164_v1 }
 0xbb7   :  { %1256 = vrot.lane.b32.xlu1 %v3594_v37, %s3165_s3  ;;  %2765 = vmatprep.subr.bf16.mxu0 %v3606_v48 }
 0xbb8   :  { %1253 = vrot.lane.b32.xlu0 %v3588_v34, %s3166_s12 }
 0xbba   :  { %2767 = vmatpush1.bf16.msra.mxu0 %v3610_v51 }
 0xbbb   :  { %2769 = vmatprep.subr.bf16.mxu0 %v3616_v7 }
 0xbbe   :  { %2771 = vmatpush1.bf16.msra.mxu0 %v3620_v11 }
 0xbbf   :  { %2773 = vmatprep.subr.bf16.mxu0 %v3624_v24 }
 0xbc2   :  { %2775 = vmatpush1.bf16.msra.mxu0 %v3626_v45 }
 0xbc3   :  { %2793 = vmatprep.subr.bf16.mxu0 %v3596_v38 }
 0xc21   :  { %v1243_v53 = vpop.permute.xlu1 %1242 }
 0xc22   :  { %v1238_v42 = vpop.permute.xlu0 %1237  ;;  %v1245_v40 = vsel %vm326_vm7, %v1243_v53, %v3594_v37  ;;  %v1289_v37 = vrot.slane %v3386_v27, 2 }
 0xc23   :  { %v1240_v32 = vsel %vm326_vm7, %v3588_v34, %v1238_v42  ;;  %v1263_v41 = vmul.f32 %v1261_v26, %v1245_v40  ;;  %v1278_v34 = vrot.slane %v3509_v31, 2 }
 0xc25   :  { %v1250_v49 = vpop.permute.xlu1 %1249  ;;  %v1280_v31 = vsel %vm326_vm7, %v3477_v52, %v1278_v34  ;;  %v1338_v52 = vrot.slane %v1333_v2, %v134_v39 }
 0xc26   :  { %v1247_v29 = vpop.permute.xlu0 %1246 }
 0xc27   :  { %v1252_v9 = vsel %vm326_vm7, %v1247_v29, %v1250_v49 }
 0xc28   :  { %v1264_v19 = vmul.f32 %v1252_v9, %v1240_v32 }
 0xc29   :  { %v1257_v43 = vpop.permute.xlu1 %1256 }
 0xc2a   :  { %v1265_v55 = vadd.f32 %v1264_v19, %v1263_v41  ;;  %v1254_v23 = vpop.permute.xlu0 %1253 }
 0xc2b   :  { %v1259_v30 = vsel %vm326_vm7, %v1254_v23, %v1257_v43 }
 0xc2c   :  { %2975 = vtanh.f32 %v1265_v55 }
 0xc36   :  { %v2976_v28 = vpop.eup %2975 }
 0xc37   :  { %v1267_v54 = vmul.f32 %v2976_v28, %v1259_v30 }
 0xc39   :  { %v1269_v46 = vrot.slane %v1267_v54, 6  ;;  %v1291_v50 = vsel %vm326_vm7, %v1267_v54, %v1289_v37 }
 0xc3a   :  { %v1300_v56 = vsel %vm1296_vm11, %v3579_v4, %v1291_v50  ;;  %v1342_v4 = vrot.slane %v1333_v2, %v138_v36 }
 0xc3b   :  { %v1271_v58 = vsel %vm326_vm7, %v3386_v27, %v1269_v46 }
 0xc3c   :  { %v1293_v59 = vsel %vm1292_vm9, %v1271_v58, %v1274_v57 }
 0xc3d   :  { %v1295_v15 = vsel %vm1294_vm10, %v1293_v59, %v1277_v61 }
 0xc3e   :  { %v1297_v60 = vsel %vm1296_vm11, %v1295_v15, %v1280_v31 }
 0xc3f   :  { %2553 = vmatmul.mubr.msk.f32.vlgmr.msra.gmra.mrb[8].mxu1 %vm229_vm8, %v1297_v60 }
 0xc40   :  { %1421 = vmatprep.mubr.f32.mxu1 %v3164_v1  ;;  %2747 = vmatpush1.bf16.msra.mxu1 %v3600_v18 }
 0xc41   :  { %2749 = vmatprep.subr.bf16.mxu1 %v3606_v48 }
 0xc43   :  { %2554 = vmatmul.mubr.msk.f32.gmra.mrb[10].mxu1 %vm229_vm8, %v1300_v56 }
 0xc44   :  { %2751 = vmatpush1.bf16.msra.mxu1 %v3610_v51  ;;  %1618 = vmatprep.mubr.f32.mxu1 %v3164_v1 }
 0xc45   :  { %2753 = vmatprep.subr.bf16.mxu1 %v3616_v7 }
 0xc48   :  { %2755 = vmatpush1.bf16.msra.mxu1 %v3620_v11 }
 0xc49   :  { %2757 = vmatprep.subr.bf16.mxu1 %v3624_v24 }
 0xc4c   :  { %2759 = vmatpush1.bf16.msra.mxu1 %v3626_v45 }
 0xc4d   :  { %2777 = vmatprep.subr.bf16.mxu1 %v3596_v38 }
 0xc88   :  { %v1497_v27 = vpop.f32.mrb[12].mxu0 }
 0xc89   :  { %v1499_v14 = vpop.f32.mrb[13].mxu0 }
 0xd12   :  { %v1417_v62 = vpop.f32.mrb[8].mxu1 }
 0xd13   :  { %v3686_v63 = vadd.f32 %v1417_v62, %v1338_v52  ;;  %v1419_v6 = vpop.f32.mrb[9].mxu1 }
 0xd14   :  { %v3688_v8 = vadd.f32 %v1419_v6, %v1342_v4 }
 0xd15   :  { %v1502_v10 = vadd.f32 %v1497_v27, %v3686_v63 }
 0xd16   :  { %v1423_v12 = vpop.f32.mrb[10].mxu1 }
 0xd17   :  { %v2555_v13 = vmul.f32 -1.442695, %v1502_v10  ;;  %v3691_v16 = vadd.f32 %v1423_v12, %v1338_v52  ;;  %v1425_v17 = vpop.f32.mrb[11].mxu1 }
 0xd18   :  { %v3693_v20 = vadd.f32 %v1425_v17, %v1342_v4 }
 0xd19   :  { %2977 = vpow2.f32 %v2555_v13 }
 0xd1a   :  { %v1429_v39 = vrot.slane %v3693_v20, 6  ;;  %v1549_v57 = vrot.slane %v3693_v20, 2 }
 0xd1c   :  { %v1503_v35 = vadd.f32 %v1499_v14, %v1429_v39 }
 0xd1e   :  { %v2556_v36 = vmul.f32 -1.442695, %v1503_v35 }
 0xd20   :  { %2979 = vpow2.f32 %v2556_v36 }
 0xd21   :  { %2981 = vtanh.f32 %v1502_v10 }
 0xd23   :  { %v2978_v21 = vpop.eup %2977 }
 0xd24   :  { %v1512_v5 = vadd.f32 1.0, %v2978_v21 }
 0xd26   :  { %2983 = vrcp.f32 %v1512_v5 }
 0xd27   :  { %2985 = vtanh.f32 %v1503_v35 }
 0xd2a   :  { %v2980_v22 = vpop.eup %2979 }
 0xd2b   :  { %v1513_v25 = vadd.f32 1.0, %v2980_v22  ;;  %v2982_v47 = vpop.eup %2981 }
 0xd2d   :  { %2987 = vrcp.f32 %v1513_v25 }
 0xd30   :  { %v2984_v53 = vpop.eup %2983 }
 0xd31   :  { %v1518_v42 = vsel %vm3364_vm5, %v2982_v47, %v2984_v53  ;;  %v2986_v40 = vpop.eup %2985 }
 0xd32   :  { %1526 = vrot.lane.b32.xlu1 %v1518_v42, %s3167_s15 }
 0xd37   :  { %v2988_v49 = vpop.eup %2987 }
 0xd38   :  { %v1519_v26 = vsel %vm3368_vm6, %v2986_v40, %v2988_v49 }
 0xd39   :  { %1521 = vrot.lane.b32.xlu0 %v1519_v26, %s3166_s12  ;;  %1533 = vrot.lane.b32.xlu1 %v1519_v26, %s3167_s15 }
 0xd3d   :  { %1530 = vrot.lane.b32.xlu0 %v1518_v42, %s3165_s3  ;;  %1540 = vrot.lane.b32.xlu1 %v1519_v26, %s3165_s3 }
 0xd41   :  { %1537 = vrot.lane.b32.xlu0 %v1518_v42, %s3166_s12 }
 0xda4   :  { %v1527_v29 = vpop.permute.xlu1 %1526 }
 0xda5   :  { %v1529_v9 = vsel %vm326_vm7, %v1527_v29, %v1519_v26 }
 0xda6   :  { %v1544_v23 = vmul.f32 0.0, %v1529_v9 }
 0xdab   :  { %v1522_v32 = vpop.permute.xlu0 %1521  ;;  %v1534_v41 = vpop.permute.xlu1 %1533 }
 0xdac   :  { %v1524_v55 = vsel %vm326_vm7, %v1518_v42, %v1522_v32 }
 0xdaf   :  { %v1531_v19 = vpop.permute.xlu0 %1530  ;;  %v1541_v33 = vpop.permute.xlu1 %1540 }
 0xdb0   :  { %v1536_v43 = vsel %vm326_vm7, %v1531_v19, %v1534_v41 }
 0xdb1   :  { %v1545_v28 = vmul.f32 %v1536_v43, %v1524_v55 }
 0xdb3   :  { %v1546_v30 = vadd.f32 %v1545_v28, %v1544_v23  ;;  %v1538_v37 = vpop.permute.xlu0 %1537 }
 0xdb4   :  { %v1543_v44 = vsel %vm326_vm7, %v1538_v37, %v1541_v33 }
 0xdb5   :  { %2989 = vtanh.f32 %v1546_v30  ;;  %v1674_v21 = vrot.slane %v1546_v30, 6 }
 0xdbf   :  { %v2990_v54 = vpop.eup %2989 }
 0xdc0   :  { %v3712_v34 = vmul.f32 %v2990_v54, %v1543_v44 }
 0xdc2   :  { %2557 = vmatmul.mubr.msk.f32.vlgmr.msra.gmra.mrb[12].mxu1 %vm229_vm8, %v3712_v34 }
 0xdc3   :  { %2779 = vmatpush1.bf16.msra.mxu1 %v3600_v18  ;;  %1880 = vmatprep.mubr.f32.mxu1 %v3164_v1 }
 0xdc4   :  { %2781 = vmatprep.subr.bf16.mxu1 %v3606_v48 }
 0xdc7   :  { %2783 = vmatpush1.bf16.msra.mxu1 %v3610_v51 }
 0xdc8   :  { %2785 = vmatprep.subr.bf16.mxu1 %v3616_v7 }
 0xdcb   :  { %2787 = vmatpush1.bf16.msra.mxu1 %v3620_v11 }
 0xdcc   :  { %2789 = vmatprep.subr.bf16.mxu1 %v3624_v24 }
 0xdcf   :  { %2791 = vmatpush1.bf16.msra.mxu1 %v3626_v45 }
 0xdd0   :  { %2809 = vmatprep.subr.bf16.mxu1 %v3596_v38 }
 0xe95   :  { %v1620_v46 = vpop.f32.mrb[12].mxu1 }
 0xe96   :  { %v1627_v50 = vrot.slane %v1620_v46, 6  ;;  %v1622_v56 = vpop.f32.mrb[13].mxu1 }
 0xe97   :  { %v1628_v58 = vrot.slane %v1622_v56, 6 }
 0xe98   :  { %v1631_v61 = vadd.f32 %v1627_v50, %v3686_v63 }
 0xe99   :  { %v1632_v59 = vadd.f32 %v1628_v58, %v1549_v57 }
 0xe9a   :  { %v2558_v31 = vmul.f32 -1.442695, %v1631_v61 }
 0xe9b   :  { %v2559_v15 = vmul.f32 -1.442695, %v1632_v59 }
 0xe9c   :  { %2991 = vpow2.f32 %v2558_v31 }
 0xe9d   :  { %2993 = vpow2.f32 %v2559_v15 }
 0xe9e   :  { %2995 = vtanh.f32 %v1631_v61 }
 0xe9f   :  { %2997 = vtanh.f32 %v1632_v59 }
 0xea6   :  { %v2992_v60 = vpop.eup %2991 }
 0xea7   :  { %v2994_v27 = vpop.eup %2993  ;;  %v1641_v14 = vadd.f32 1.0, %v2992_v60 }
 0xea8   :  { %v1642_v2 = vadd.f32 1.0, %v2994_v27  ;;  %v2996_v52 = vpop.eup %2995 }
 0xea9   :  { %2999 = vrcp.f32 %v1641_v14  ;;  %v2998_v4 = vpop.eup %2997 }
 0xeaa   :  { %3001 = vrcp.f32 %v1642_v2 }
 0xeb3   :  { %v3000_v62 = vpop.eup %2999 }
 0xeb4   :  { %v3002_v6 = vpop.eup %3001  ;;  %v1647_v10 = vsel %vm3364_vm5, %v2996_v52, %v3000_v62 }
 0xeb5   :  { %1655 = vrot.lane.b32.xlu1 %v1647_v10, %s3167_s15  ;;  %v1648_v12 = vsel %vm3368_vm6, %v2998_v4, %v3002_v6 }
 0xeb6   :  { %1650 = vrot.lane.b32.xlu0 %v1648_v12, %s3166_s12 }
 0xeb9   :  { %1662 = vrot.lane.b32.xlu1 %v1648_v12, %s3167_s15 }
 0xeba   :  { %1659 = vrot.lane.b32.xlu0 %v1647_v10, %s3165_s3 }
 0xebd   :  { %1669 = vrot.lane.b32.xlu1 %v1648_v12, %s3165_s3 }
 0xebe   :  { %1666 = vrot.lane.b32.xlu0 %v1647_v10, %s3166_s12 }
 0xf27   :  { %v1656_v13 = vpop.permute.xlu1 %1655 }
 0xf28   :  { %v1651_v17 = vpop.permute.xlu0 %1650  ;;  %v1658_v35 = vsel %vm326_vm7, %v1656_v13, %v1648_v12 }
 0xf29   :  { %v1653_v22 = vsel %vm326_vm7, %v1647_v10, %v1651_v17  ;;  %v1676_v47 = vmul.f32 %v1674_v21, %v1658_v35 }
 0xf2b   :  { %v1663_v36 = vpop.permute.xlu1 %1662 }
 0xf2c   :  { %v1660_v5 = vpop.permute.xlu0 %1659 }
 0xf2d   :  { %v1665_v25 = vsel %vm326_vm7, %v1660_v5, %v1663_v36 }
 0xf2e   :  { %v1677_v53 = vmul.f32 %v1665_v25, %v1653_v22 }
 0xf2f   :  { %v1670_v40 = vpop.permute.xlu1 %1669 }
 0xf30   :  { %v1678_v42 = vadd.f32 %v1677_v53, %v1676_v47  ;;  %v1667_v49 = vpop.permute.xlu0 %1666 }
 0xf31   :  { %v1672_v29 = vsel %vm326_vm7, %v1667_v49, %v1670_v40 }
 0xf32   :  { %3003 = vtanh.f32 %v1678_v42  ;;  %v1805_v14 = vrot.slane %v1678_v42, 6 }
 0xf3c   :  { %v3004_v26 = vpop.eup %3003 }
 0xf3d   :  { %v3743_v32 = vmul.f32 %v3004_v26, %v1672_v29 }
 0xf3f   :  { %v1682_v9 = vrot.slane %v3743_v32, 2 }
 0xf41   :  { %2560 = vmatmul.mubr.msk.f32.vlgmr.msra.gmra.mrb[14].mxu0 %vm229_vm8, %v1682_v9 }
 0xf42   :  { %2795 = vmatpush1.bf16.msra.mxu0 %v3600_v18  ;;  %2014 = vmatprep.mubr.f32.mxu0 %v3164_v1 }
 0xf43   :  { %2797 = vmatprep.subr.bf16.mxu0 %v3606_v48 }
 0xf46   :  { %2799 = vmatpush1.bf16.msra.mxu0 %v3610_v51 }
 0xf47   :  { %2801 = vmatprep.subr.bf16.mxu0 %v3616_v7 }
 0xf4a   :  { %2803 = vmatpush1.bf16.msra.mxu0 %v3620_v11 }
 0xf4b   :  { %2805 = vmatprep.subr.bf16.mxu0 %v3624_v24 }
 0xf4e   :  { %2807 = vmatpush1.bf16.msra.mxu0 %v3626_v45 }
 0xf4f   :  { %2825 = vmatprep.subr.bf16.mxu0 %v3596_v38 }
0x1014   :  { %v1751_v41 = vpop.f32.mrb[14].mxu0 }
0x1015   :  { %v1758_v19 = vrot.slane %v1751_v41, 4  ;;  %v1753_v55 = vpop.f32.mrb[15].mxu0 }
0x1016   :  { %v1759_v43 = vrot.slane %v1753_v55, 4 }
0x1017   :  { %v1762_v23 = vadd.f32 %v1758_v19, %v3686_v63 }
0x1018   :  { %v1763_v28 = vadd.f32 %v1759_v43, %v1429_v39 }
0x1019   :  { %v2561_v30 = vmul.f32 -1.442695, %v1762_v23 }
0x101a   :  { %v2562_v37 = vmul.f32 -1.442695, %v1763_v28 }
0x101b   :  { %3005 = vpow2.f32 %v2561_v30 }
0x101c   :  { %3007 = vpow2.f32 %v2562_v37 }
0x101d   :  { %3009 = vtanh.f32 %v1762_v23 }
0x101e   :  { %3011 = vtanh.f32 %v1763_v28 }
0x1025   :  { %v3006_v33 = vpop.eup %3005 }
0x1026   :  { %v3008_v54 = vpop.eup %3007  ;;  %v1772_v44 = vadd.f32 1.0, %v3006_v33 }
0x1027   :  { %v1773_v46 = vadd.f32 1.0, %v3008_v54  ;;  %v3010_v50 = vpop.eup %3009 }
0x1028   :  { %3013 = vrcp.f32 %v1772_v44  ;;  %v3012_v56 = vpop.eup %3011 }
0x1029   :  { %3015 = vrcp.f32 %v1773_v46 }
0x1032   :  { %v3014_v58 = vpop.eup %3013 }
0x1033   :  { %v3016_v61 = vpop.eup %3015  ;;  %v1778_v59 = vsel %vm3364_vm5, %v3010_v50, %v3014_v58 }
0x1034   :  { %1786 = vrot.lane.b32.xlu1 %v1778_v59, %s3167_s15  ;;  %v1779_v39 = vsel %vm3368_vm6, %v3012_v56, %v3016_v61 }
0x1035   :  { %1781 = vrot.lane.b32.xlu0 %v1779_v39, %s3166_s12 }
0x1038   :  { %1793 = vrot.lane.b32.xlu1 %v1779_v39, %s3167_s15 }
0x1039   :  { %1790 = vrot.lane.b32.xlu0 %v1778_v59, %s3165_s3 }
0x103c   :  { %1800 = vrot.lane.b32.xlu1 %v1779_v39, %s3165_s3 }
0x103d   :  { %1797 = vrot.lane.b32.xlu0 %v1778_v59, %s3166_s12 }
0x10a6   :  { %v1787_v31 = vpop.permute.xlu1 %1786 }
0x10a7   :  { %v1782_v15 = vpop.permute.xlu0 %1781  ;;  %v1789_v60 = vsel %vm326_vm7, %v1787_v31, %v1779_v39 }
0x10a8   :  { %v1784_v52 = vsel %vm326_vm7, %v1778_v59, %v1782_v15  ;;  %v1807_v62 = vmul.f32 %v1805_v14, %v1789_v60 }
0x10aa   :  { %v1794_v27 = vpop.permute.xlu1 %1793 }
0x10ab   :  { %v1791_v2 = vpop.permute.xlu0 %1790 }
0x10ac   :  { %v1796_v4 = vsel %vm326_vm7, %v1791_v2, %v1794_v27  ;;  %v1944_v27 = vrot.slane %v3688_v8, 6 }
0x10ad   :  { %v1808_v6 = vmul.f32 %v1796_v4, %v1784_v52 }
0x10ae   :  { %v1801_v12 = vpop.permute.xlu1 %1800 }
0x10af   :  { %v1809_v10 = vadd.f32 %v1808_v6, %v1807_v62  ;;  %v1798_v13 = vpop.permute.xlu0 %1797 }
0x10b0   :  { %v1803_v35 = vsel %vm326_vm7, %v1798_v13, %v1801_v12 }
0x10b1   :  { %3017 = vtanh.f32 %v1809_v10  ;;  %v1936_v37 = vrot.slane %v1809_v10, 6 }
0x10bb   :  { %v3018_v17 = vpop.eup %3017 }
0x10bc   :  { %v3773_v36 = vmul.f32 %v3018_v17, %v1803_v35 }
0x10be   :  { %v1813_v21 = vrot.slane %v3773_v36, 4 }
0x10c0   :  { %2563 = vmatmul.mubr.msk.f32.vlgmr.msra.gmra.mrb[14].mxu1 %vm229_vm8, %v1813_v21 }
0x10c1   :  { %2811 = vmatpush1.bf16.msra.mxu1 %v3600_v18  ;;  %2140 = vmatprep.mubr.f32.mxu1 %v3164_v1 }
0x10c2   :  { %2813 = vmatprep.subr.bf16.mxu1 %v3606_v48 }
0x10c5   :  { %2815 = vmatpush1.bf16.msra.mxu1 %v3610_v51 }
0x10c6   :  { %2817 = vmatprep.subr.bf16.mxu1 %v3616_v7 }
0x10c9   :  { %2819 = vmatpush1.bf16.msra.mxu1 %v3620_v11 }
0x10ca   :  { %2821 = vmatprep.subr.bf16.mxu1 %v3624_v24 }
0x10cd   :  { %2823 = vmatpush1.bf16.msra.mxu1 %v3626_v45 }
0x10ce   :  { %2841 = vmatprep.subr.bf16.mxu1 %v3596_v38 }
0x1193   :  { %v1882_v5 = vpop.f32.mrb[14].mxu1 }
0x1194   :  { %v1889_v22 = vrot.slane %v1882_v5, 2  ;;  %v1884_v25 = vpop.f32.mrb[15].mxu1 }
0x1195   :  { %v1890_v47 = vrot.slane %v1884_v25, 2 }
0x1196   :  { %v1893_v53 = vadd.f32 %v1889_v22, %v3686_v63 }
0x1197   :  { %v1894_v42 = vadd.f32 %v1890_v47, %v1549_v57 }
0x1198   :  { %v2564_v40 = vmul.f32 -1.442695, %v1893_v53 }
0x1199   :  { %v2565_v49 = vmul.f32 -1.442695, %v1894_v42 }
0x119a   :  { %3019 = vpow2.f32 %v2564_v40 }
0x119b   :  { %3021 = vpow2.f32 %v2565_v49 }
0x119c   :  { %3023 = vtanh.f32 %v1893_v53 }
0x119d   :  { %3025 = vtanh.f32 %v1894_v42 }
0x11a4   :  { %v3020_v26 = vpop.eup %3019 }
0x11a5   :  { %v3022_v29 = vpop.eup %3021  ;;  %v1903_v9 = vadd.f32 1.0, %v3020_v26 }
0x11a6   :  { %v1904_v41 = vadd.f32 1.0, %v3022_v29  ;;  %v3024_v38 = vpop.eup %3023 }
0x11a7   :  { %3027 = vrcp.f32 %v1903_v9  ;;  %v3026_v19 = vpop.eup %3025 }
0x11a8   :  { %3029 = vrcp.f32 %v1904_v41 }
0x11b1   :  { %v3028_v55 = vpop.eup %3027 }
0x11b2   :  { %v3030_v43 = vpop.eup %3029  ;;  %v1909_v63 = vsel %vm3364_vm5, %v3024_v38, %v3028_v55 }
0x11b3   :  { %1917 = vrot.lane.b32.xlu1 %v1909_v63, %s3167_s15  ;;  %v1910_v20 = vsel %vm3368_vm6, %v3026_v19, %v3030_v43 }
0x11b4   :  { %1912 = vrot.lane.b32.xlu0 %v1910_v20, %s3166_s12 }
0x11b7   :  { %1924 = vrot.lane.b32.xlu1 %v1910_v20, %s3167_s15 }
0x11b8   :  { %1921 = vrot.lane.b32.xlu0 %v1909_v63, %s3165_s3 }
0x11bb   :  { %1931 = vrot.lane.b32.xlu1 %v1910_v20, %s3165_s3 }
0x11bc   :  { %1928 = vrot.lane.b32.xlu0 %v1909_v63, %s3166_s12 }
0x1225   :  { %v1918_v57 = vpop.permute.xlu1 %1917 }
0x1226   :  { %v1913_v23 = vpop.permute.xlu0 %1912  ;;  %v1920_v28 = vsel %vm326_vm7, %v1918_v57, %v1910_v20 }
0x1227   :  { %v1915_v54 = vsel %vm326_vm7, %v1909_v63, %v1913_v23  ;;  %v1938_v46 = vmul.f32 %v1936_v37, %v1920_v28  ;;  %v2071_v37 = vrot.slane %v3688_v8, 2 }
0x1229   :  { %v1925_v30 = vpop.permute.xlu1 %1924 }
0x122a   :  { %v1922_v33 = vpop.permute.xlu0 %1921 }
0x122b   :  { %v1927_v44 = vsel %vm326_vm7, %v1922_v33, %v1925_v30 }
0x122c   :  { %v1939_v50 = vmul.f32 %v1927_v44, %v1915_v54 }
0x122d   :  { %v1932_v58 = vpop.permute.xlu1 %1931 }
0x122e   :  { %v1940_v56 = vadd.f32 %v1939_v50, %v1938_v46  ;;  %v1929_v61 = vpop.permute.xlu0 %1928 }
0x122f   :  { %v1934_v39 = vsel %vm326_vm7, %v1929_v61, %v1932_v58 }
0x1230   :  { %3031 = vtanh.f32 %v1940_v56  ;;  %v2064_v49 = vrot.slane %v1940_v56, 6 }
0x123a   :  { %v3032_v59 = vpop.eup %3031 }
0x123b   :  { %v3803_v31 = vmul.f32 %v3032_v59, %v1934_v39 }
0x123d   :  { %v1947_v15 = vrot.slane %v3803_v31, 6 }
0x123f   :  { %2566 = vmatmul.mubr.msk.f32.vlgmr.msra.gmra.mrb[16].mxu0 %vm229_vm8, %v1947_v15 }
0x1240   :  { %2827 = vmatpush1.bf16.msra.mxu0 %v3600_v18  ;;  %2271 = vmatprep.mubr.f32.mxu0 %v3164_v1 }
0x1241   :  { %2829 = vmatprep.subr.bf16.mxu0 %v3606_v48 }
0x1244   :  { %2831 = vmatpush1.bf16.msra.mxu0 %v3610_v51 }
0x1245   :  { %2833 = vmatprep.subr.bf16.mxu0 %v3616_v7 }
0x1248   :  { %2835 = vmatpush1.bf16.msra.mxu0 %v3620_v11 }
0x1249   :  { %2837 = vmatprep.subr.bf16.mxu0 %v3624_v24 }
0x124c   :  { %2839 = vmatpush1.bf16.msra.mxu0 %v3626_v45 }
0x1312   :  { %v2016_v60 = vpop.f32.mrb[16].mxu0 }
0x1313   :  { %v2021_v14 = vadd.f32 %v2016_v60, %v3691_v16  ;;  %v2018_v2 = vpop.f32.mrb[17].mxu0 }
0x1314   :  { %v2022_v52 = vadd.f32 %v2018_v2, %v1944_v27 }
0x1315   :  { %v2567_v4 = vmul.f32 -1.442695, %v2021_v14 }
0x1316   :  { %v2568_v62 = vmul.f32 -1.442695, %v2022_v52 }
0x1317   :  { %3033 = vpow2.f32 %v2567_v4 }
0x1318   :  { %3035 = vpow2.f32 %v2568_v62 }
0x1319   :  { %3037 = vtanh.f32 %v2021_v14 }
0x131a   :  { %3039 = vtanh.f32 %v2022_v52 }
0x1321   :  { %v3034_v6 = vpop.eup %3033 }
0x1322   :  { %v3036_v10 = vpop.eup %3035  ;;  %v2031_v12 = vadd.f32 1.0, %v3034_v6 }
0x1323   :  { %v2032_v13 = vadd.f32 1.0, %v3036_v10  ;;  %v3038_v17 = vpop.eup %3037 }
0x1324   :  { %3041 = vrcp.f32 %v2031_v12  ;;  %v3040_v35 = vpop.eup %3039 }
0x1325   :  { %3043 = vrcp.f32 %v2032_v13 }
0x132e   :  { %v3042_v21 = vpop.eup %3041 }
0x132f   :  { %v3044_v5 = vpop.eup %3043  ;;  %v2037_v22 = vsel %vm3364_vm5, %v3038_v17, %v3042_v21  ;;  %v2480_v21 = vrot.slane %v3773_v36, 2 }
0x1330   :  { %2045 = vrot.lane.b32.xlu1 %v2037_v22, %s3167_s15  ;;  %v2038_v25 = vsel %vm3368_vm6, %v3040_v35, %v3044_v5 }
0x1331   :  { %2040 = vrot.lane.b32.xlu0 %v2038_v25, %s3166_s12 }
0x1334   :  { %2052 = vrot.lane.b32.xlu1 %v2038_v25, %s3167_s15 }
0x1335   :  { %2049 = vrot.lane.b32.xlu0 %v2037_v22, %s3165_s3 }
0x1338   :  { %2059 = vrot.lane.b32.xlu1 %v2038_v25, %s3165_s3 }
0x1339   :  { %2056 = vrot.lane.b32.xlu0 %v2037_v22, %s3166_s12 }
0x13a2   :  { %v2046_v47 = vpop.permute.xlu1 %2045 }
0x13a3   :  { %v2041_v53 = vpop.permute.xlu0 %2040  ;;  %v2048_v42 = vsel %vm326_vm7, %v2046_v47, %v2038_v25 }
0x13a4   :  { %v2043_v29 = vsel %vm326_vm7, %v2037_v22, %v2041_v53  ;;  %v2066_v41 = vmul.f32 %v2064_v49, %v2048_v42 }
0x13a6   :  { %v2053_v40 = vpop.permute.xlu1 %2052 }
0x13a7   :  { %v2050_v26 = vpop.permute.xlu0 %2049 }
0x13a8   :  { %v2055_v9 = vsel %vm326_vm7, %v2050_v26, %v2053_v40 }
0x13a9   :  { %v2067_v38 = vmul.f32 %v2055_v9, %v2043_v29 }
0x13aa   :  { %v2060_v55 = vpop.permute.xlu1 %2059 }
0x13ab   :  { %v2068_v19 = vadd.f32 %v2067_v38, %v2066_v41  ;;  %v2057_v43 = vpop.permute.xlu0 %2056 }
0x13ac   :  { %v2062_v20 = vsel %vm326_vm7, %v2057_v43, %v2060_v55 }
0x13ad   :  { %3045 = vtanh.f32 %v2068_v19  ;;  %v2196_v14 = vrot.slane %v2068_v19, 6 }
0x13b7   :  { %v3046_v63 = vpop.eup %3045 }
0x13b8   :  { %v3835_v57 = vmul.f32 %v3046_v63, %v2062_v20 }
0x13ba   :  { %2569 = vmatmul.mubr.msk.f32.vlgmr.msra.gmra.mrb[16].mxu1 %vm229_vm8, %v3835_v57  ;;  %v2479_v22 = vsel %vm326_vm7, %v3835_v57, %v1947_v15 }
0x13bb   :  { %2843 = vmatpush1.bf16.msra.mxu1 %v3600_v18  ;;  %2402 = vmatprep.mubr.f32.mxu1 %v3164_v1 }
0x13bc   :  { %2845 = vmatprep.subr.bf16.mxu1 %v3606_v48 }
0x13bf   :  { %2847 = vmatpush1.bf16.msra.mxu1 %v3610_v51 }
0x13c0   :  { %2849 = vmatprep.subr.bf16.mxu1 %v3616_v7 }
0x13c3   :  { %2851 = vmatpush1.bf16.msra.mxu1 %v3620_v11 }
0x13c4   :  { %2853 = vmatprep.subr.bf16.mxu1 %v3624_v24 }
0x13c7   :  { %2855 = vmatpush1.bf16.msra.mxu1 %v3626_v45 }
0x148d   :  { %v2142_v23 = vpop.f32.mrb[16].mxu1 }
0x148e   :  { %v2149_v28 = vrot.slane %v2142_v23, 6  ;;  %v2144_v30 = vpop.f32.mrb[17].mxu1 }
0x148f   :  { %v2150_v18 = vrot.slane %v2144_v30, 6 }
0x1490   :  { %v2153_v1 = vadd.f32 %v2149_v28, %v3691_v16 }
0x1491   :  { %v2154_v48 = vadd.f32 %v2150_v18, %v2071_v37 }
0x1492   :  { %v2570_v51 = vmul.f32 -1.442695, %v2153_v1 }
0x1493   :  { %v2571_v33 = vmul.f32 -1.442695, %v2154_v48 }
0x1494   :  { %3047 = vpow2.f32 %v2570_v51 }
0x1495   :  { %3049 = vpow2.f32 %v2571_v33 }
0x1496   :  { %3051 = vtanh.f32 %v2153_v1 }
0x1497   :  { %3053 = vtanh.f32 %v2154_v48 }
0x149e   :  { %v3048_v7 = vpop.eup %3047 }
0x149f   :  { %v3050_v11 = vpop.eup %3049  ;;  %v2163_v24 = vadd.f32 1.0, %v3048_v7 }
0x14a0   :  { %v2164_v45 = vadd.f32 1.0, %v3050_v11  ;;  %v3052_v54 = vpop.eup %3051 }
0x14a1   :  { %3055 = vrcp.f32 %v2163_v24  ;;  %v3054_v44 = vpop.eup %3053 }
0x14a2   :  { %3057 = vrcp.f32 %v2164_v45 }
0x14ab   :  { %v3056_v46 = vpop.eup %3055 }
0x14ac   :  { %v3058_v50 = vpop.eup %3057  ;;  %v2169_v56 = vsel %vm3364_vm5, %v3052_v54, %v3056_v46 }
0x14ad   :  { %2177 = vrot.lane.b32.xlu1 %v2169_v56, %s3167_s15  ;;  %v2170_v58 = vsel %vm3368_vm6, %v3054_v44, %v3058_v50 }
0x14ae   :  { %2172 = vrot.lane.b32.xlu0 %v2170_v58, %s3166_s12 }
0x14b1   :  { %2184 = vrot.lane.b32.xlu1 %v2170_v58, %s3167_s15 }
0x14b2   :  { %2181 = vrot.lane.b32.xlu0 %v2169_v56, %s3165_s3 }
0x14b5   :  { %2191 = vrot.lane.b32.xlu1 %v2170_v58, %s3165_s3 }
0x14b6   :  { %2188 = vrot.lane.b32.xlu0 %v2169_v56, %s3166_s12 }
0x151f   :  { %v2178_v61 = vpop.permute.xlu1 %2177 }
0x1520   :  { %v2173_v59 = vpop.permute.xlu0 %2172  ;;  %v2180_v39 = vsel %vm326_vm7, %v2178_v61, %v2170_v58  ;;  %v2483_v61 = vrot.slane %v3743_v32, 6 }
0x1521   :  { %v2175_v52 = vsel %vm326_vm7, %v2169_v56, %v2173_v59  ;;  %v2198_v62 = vmul.f32 %v2196_v14, %v2180_v39 }
0x1523   :  { %v2185_v60 = vpop.permute.xlu1 %2184 }
0x1524   :  { %v2182_v2 = vpop.permute.xlu0 %2181 }
0x1525   :  { %v2187_v4 = vsel %vm326_vm7, %v2182_v2, %v2185_v60 }
0x1526   :  { %v2199_v6 = vmul.f32 %v2187_v4, %v2175_v52 }
0x1527   :  { %v2192_v12 = vpop.permute.xlu1 %2191 }
0x1528   :  { %v2200_v10 = vadd.f32 %v2199_v6, %v2198_v62  ;;  %v2189_v13 = vpop.permute.xlu0 %2188 }
0x1529   :  { %v2194_v35 = vsel %vm326_vm7, %v2189_v13, %v2192_v12 }
0x152a   :  { %3059 = vtanh.f32 %v2200_v10  ;;  %v2327_v33 = vrot.slane %v2200_v10, 6 }
0x1534   :  { %v3060_v17 = vpop.eup %3059 }
0x1535   :  { %v3866_v5 = vmul.f32 %v3060_v17, %v2194_v35 }
0x1537   :  { %v2204_v25 = vrot.slane %v3866_v5, 2  ;;  %v2482_v47 = vsel %vm326_vm7, %v3866_v5, %v2480_v21 }
0x1538   :  { %v2492_v53 = vsel %vm1292_vm9, %v2479_v22, %v2482_v47 }
0x1539   :  { %2572 = vmatmul.mubr.msk.f32.vlgmr.msra.gmra.mrb[18].mxu0 %vm229_vm8, %v2204_v25 }
0x160c   :  { %v2273_v42 = vpop.f32.mrb[18].mxu0 }
0x160d   :  { %v2280_v40 = vrot.slane %v2273_v42, 4  ;;  %v2275_v49 = vpop.f32.mrb[19].mxu0 }
0x160e   :  { %v2281_v26 = vrot.slane %v2275_v49, 4 }
0x160f   :  { %v2284_v29 = vadd.f32 %v2280_v40, %v3691_v16 }
0x1610   :  { %v2285_v9 = vadd.f32 %v2281_v26, %v1944_v27 }
0x1611   :  { %v2573_v41 = vmul.f32 -1.442695, %v2284_v29 }
0x1612   :  { %v2574_v15 = vmul.f32 -1.442695, %v2285_v9 }
0x1613   :  { %3061 = vpow2.f32 %v2573_v41 }
0x1614   :  { %3063 = vpow2.f32 %v2574_v15 }
0x1615   :  { %3065 = vtanh.f32 %v2284_v29 }
0x1616   :  { %3067 = vtanh.f32 %v2285_v9 }
0x161d   :  { %v3062_v38 = vpop.eup %3061 }
0x161e   :  { %v3064_v19 = vpop.eup %3063  ;;  %v2294_v55 = vadd.f32 1.0, %v3062_v38 }
0x161f   :  { %v2295_v43 = vadd.f32 1.0, %v3064_v19  ;;  %v3066_v63 = vpop.eup %3065 }
0x1620   :  { %3069 = vrcp.f32 %v2294_v55  ;;  %v3068_v20 = vpop.eup %3067 }
0x1621   :  { %3071 = vrcp.f32 %v2295_v43 }
0x162a   :  { %v3070_v23 = vpop.eup %3069 }
0x162b   :  { %v3072_v28 = vpop.eup %3071  ;;  %v2300_v30 = vsel %vm3364_vm5, %v3066_v63, %v3070_v23 }
0x162c   :  { %2308 = vrot.lane.b32.xlu1 %v2300_v30, %s3167_s15  ;;  %v2301_v27 = vsel %vm3368_vm6, %v3068_v20, %v3072_v28  ;;  %v2486_v20 = vrot.slane %v3712_v34, 2 }
0x162d   :  { %2303 = vrot.lane.b32.xlu0 %v2301_v27, %s3166_s12 }
0x1630   :  { %2315 = vrot.lane.b32.xlu1 %v2301_v27, %s3167_s15 }
0x1631   :  { %2312 = vrot.lane.b32.xlu0 %v2300_v30, %s3165_s3 }
0x1634   :  { %2322 = vrot.lane.b32.xlu1 %v2301_v27, %s3165_s3 }
0x1635   :  { %2319 = vrot.lane.b32.xlu0 %v2300_v30, %s3166_s12 }
0x169e   :  { %v2309_v18 = vpop.permute.xlu1 %2308 }
0x169f   :  { %v2304_v1 = vpop.permute.xlu0 %2303  ;;  %v2311_v48 = vsel %vm326_vm7, %v2309_v18, %v2301_v27  ;;  %v2578_v27 = vld [vmem:[%s3954_s7] ss:$0 sm:$0xff]  ;;  %v2475_v18 = vrot.slane %v3835_v57, 2 }
0x16a0   :  { %v2306_v11 = vsel %vm326_vm7, %v2300_v30, %v2304_v1  ;;  %v2329_v45 = vmul.f32 %v2327_v33, %v2311_v48  ;;  %v2472_v30 = vrot.slane %v3866_v5, 6 }
0x16a1   :  { %v2477_v57 = vsel %vm326_vm7, %v3803_v31, %v2475_v18 }
0x16a2   :  { %v2316_v51 = vpop.permute.xlu1 %2315  ;;  %v2474_v5 = vsel %vm326_vm7, %v3773_v36, %v2472_v30 }
0x16a3   :  { %v2313_v7 = vpop.permute.xlu0 %2312 }
0x16a4   :  { %v2318_v24 = vsel %vm326_vm7, %v2313_v7, %v2316_v51 }
0x16a5   :  { %v2330_v54 = vmul.f32 %v2318_v24, %v2306_v11 }
0x16a6   :  { %v2323_v46 = vpop.permute.xlu1 %2322 }
0x16a7   :  { %v2331_v44 = vadd.f32 %v2330_v54, %v2329_v45  ;;  %v2320_v50 = vpop.permute.xlu0 %2319 }
0x16a8   :  { %v2325_v58 = vsel %vm326_vm7, %v2320_v50, %v2323_v46 }
0x16a9   :  { %3073 = vtanh.f32 %v2331_v44  ;;  %v2458_v26 = vrot.slane %v2331_v44, 6 }
0x16b3   :  { %v3074_v56 = vpop.eup %3073 }
0x16b4   :  { %v3895_v59 = vmul.f32 %v3074_v56, %v2325_v58 }
0x16b6   :  { %v2335_v39 = vrot.slane %v3895_v59, 4  ;;  %v2485_v60 = vsel %vm326_vm7, %v3895_v59, %v2483_v61  ;;  %v2469_v23 = vrot.slane %v3895_v59, 2 }
0x16b7   :  { %v2493_v14 = vsel %vm1294_vm10, %v2492_v53, %v2485_v60 }
0x16b8   :  { %2575 = vmatmul.mubr.msk.f32.vlgmr.msra.gmra.mrb[18].mxu1 %vm229_vm8, %v2335_v39  ;;  %v2471_v11 = vsel %vm326_vm7, %v3743_v32, %v2469_v23  ;;  %v2579_v32 = vld [vmem:[#allocation2] ss:$0 sm:$0xff] }
0x178b   :  { %v2404_v2 = vpop.f32.mrb[18].mxu1 }
0x178c   :  { %v2411_v52 = vrot.slane %v2404_v2, 2  ;;  %v2406_v4 = vpop.f32.mrb[19].mxu1 }
0x178d   :  { %v2412_v62 = vrot.slane %v2406_v4, 2 }
0x178e   :  { %v2415_v6 = vadd.f32 %v2411_v52, %v3691_v16 }
0x178f   :  { %v2416_v10 = vadd.f32 %v2412_v62, %v2071_v37 }
0x1790   :  { %v2576_v12 = vmul.f32 -1.442695, %v2415_v6 }
0x1791   :  { %v2577_v13 = vmul.f32 -1.442695, %v2416_v10 }
0x1792   :  { %3075 = vpow2.f32 %v2576_v12 }
0x1793   :  { %3077 = vpow2.f32 %v2577_v13 }
0x1794   :  { %3079 = vtanh.f32 %v2415_v6 }
0x1795   :  { %3081 = vtanh.f32 %v2416_v10 }
0x179c   :  { %v3076_v17 = vpop.eup %3075 }
0x179d   :  { %v3078_v35 = vpop.eup %3077  ;;  %v2425_v21 = vadd.f32 1.0, %v3076_v17 }
0x179e   :  { %v2426_v22 = vadd.f32 1.0, %v3078_v35  ;;  %v3080_v25 = vpop.eup %3079 }
0x179f   :  { %3083 = vrcp.f32 %v2425_v21  ;;  %v3082_v47 = vpop.eup %3081 }
0x17a0   :  { %3085 = vrcp.f32 %v2426_v22 }
0x17a9   :  { %v3084_v53 = vpop.eup %3083 }
0x17aa   :  { %v3086_v42 = vpop.eup %3085  ;;  %v2431_v8 = vsel %vm3364_vm5, %v3080_v25, %v3084_v53 }
0x17ab   :  { %2439 = vrot.lane.b32.xlu1 %v2431_v8, %s3167_s15  ;;  %v2432_v16 = vsel %vm3368_vm6, %v3082_v47, %v3086_v42 }
0x17ac   :  { %2434 = vrot.lane.b32.xlu0 %v2432_v16, %s3166_s12 }
0x17af   :  { %2446 = vrot.lane.b32.xlu1 %v2432_v16, %s3167_s15 }
0x17b0   :  { %2443 = vrot.lane.b32.xlu0 %v2431_v8, %s3165_s3 }
0x17b3   :  { %2453 = vrot.lane.b32.xlu1 %v2432_v16, %s3165_s3 }
0x17b4   :  { %2450 = vrot.lane.b32.xlu0 %v2431_v8, %s3166_s12 }
0x181d   :  { %v2440_v37 = vpop.permute.xlu1 %2439 }
0x181e   :  { %v2435_v40 = vpop.permute.xlu0 %2434  ;;  %v2442_v0 = vsel %vm326_vm7, %v2440_v37, %v2432_v16 }
0x181f   :  { %v2437_v3 = vsel %vm326_vm7, %v2431_v8, %v2435_v40  ;;  %v2460_v41 = vmul.f32 %v2458_v26, %v2442_v0 }
0x1821   :  { %v2447_v49 = vpop.permute.xlu1 %2446 }
0x1822   :  { %v2444_v29 = vpop.permute.xlu0 %2443 }
0x1823   :  { %v2449_v9 = vsel %vm326_vm7, %v2444_v29, %v2447_v49 }
0x1824   :  { %v2461_v15 = vmul.f32 %v2449_v9, %v2437_v3 }
0x1825   :  { %v2454_v19 = vpop.permute.xlu1 %2453 }
0x1826   :  { %v2462_v38 = vadd.f32 %v2461_v15, %v2460_v41  ;;  %v2451_v55 = vpop.permute.xlu0 %2450 }
0x1827   :  { %v2456_v63 = vsel %vm326_vm7, %v2451_v55, %v2454_v19 }
0x1828   :  { %3087 = vtanh.f32 %v2462_v38 }
0x1832   :  { %v3088_v43 = vpop.eup %3087 }
0x1833   :  { %v2464_v28 = vmul.f32 %v3088_v43, %v2456_v63 }
0x1835   :  { %v2466_v1 = vrot.slane %v2464_v28, 6  ;;  %v2488_v48 = vsel %vm326_vm7, %v2464_v28, %v2486_v20 }
0x1836   :  { %v2494_v51 = vsel %vm1296_vm11, %v2493_v14, %v2488_v48 }
0x1837   :  { %v2468_v33 = vsel %vm326_vm7, %v3712_v34, %v2466_v1  ;;  %v2503_v7 = vmul.f32 %v2578_v27, %v2494_v51 }
0x1838   :  { %v2489_v24 = vsel %vm1292_vm9, %v2468_v33, %v2471_v11 }
0x1839   :  { %v2507_v45 = vsel %vm229_vm8, %v2503_v7, 0.0  ;;  %v2490_v54 = vsel %vm1294_vm10, %v2489_v24, %v2474_v5 }
0x183a   :  { %2508 = vadd.xlane.f32.xlu1 %v2507_v45  ;;  %v2491_v44 = vsel %vm1296_vm11, %v2490_v54, %v2477_v57 }
0x183b   :  { %v2502_v34 = vmul.f32 %v2578_v27, %v2491_v44 }
0x183d   :  { %v2504_v46 = vsel %vm229_vm8, %v2502_v34, 0.0 }
0x183e   :  { %2505 = vadd.xlane.f32.xlu0 %v2504_v46 }
0x18c7   :  { %v2509_v50 = vpop.xlane.xlu1 %2508 }
0x18c8   :  { %v2518_v36 = vadd.f32 %v2579_v32, %v2509_v50 }
0x18ca   :  { %2521 = vst.msk [vmem:[%s3956_s9 + $0x8] sm:$0xff] %vm2519_vm12, %v2518_v36 }
0x18cb   :  { %v2506_v56 = vpop.xlane.xlu0 %2505 }
0x18cc   :  { %v2517_v58 = vadd.f32 %v2579_v32, %v2506_v56 }
0x18ce   :  { %2520 = vst.msk [vmem:[%s3956_s9] sm:$0xff] %vm2519_vm12, %v2517_v58 }
0x18cf   :  { %2526 = vsyncpa [#allocation4], 1 }
0x18d0   :  { %2527 = vsyncpa [#allocation6], 1 }

</bundles_post_ra>
